<compile_context>
chip_gen: v5e
topology: v5e:2x2
jax: 0.10.0
libtpu: 0.0.40
codegen_flags: <defaults>
</compile_context>

<pallas_src>
import functools

import jax
import jax.numpy as jnp
from jax.experimental import pallas as pl
from jax.experimental.pallas import tpu as pltpu


def _round_up(x, m):
    return (x + m - 1) // m * m


def _lstm_kernel(x_ref, wih_ref, whh_ref, b_ref, wlin_ref, blin_ref, out_ref,
                 xp_ref, h_ref, c_ref, *, seq_chunk, batch, hidden_dim):
    """One T-chunk: hoisted input projection -> unrolled recurrence -> (last chunk
    only) Linear + Softmax epilogue.  h/c persist across chunks in VMEM scratch."""
    Tc, Bp, H = seq_chunk, batch, hidden_dim
    chunk = pl.program_id(0)

    # ---- init carried state on the first chunk.
    @pl.when(chunk == 0)
    def _():
        h_ref[...] = jnp.zeros_like(h_ref)
        c_ref[...] = jnp.zeros_like(c_ref)

    # ---- Phase 1: input projection for the whole chunk in ONE MXU matmul (off the
    #      sequential chain).  x_ref: [Tc*Bp, D] time-major (bf16 or f32);
    #      wih_ref: [D, 4H] with gate columns ordered (i, f, o, g);
    #      b_ref: [1, 4H] f32 (b_ih + b_hh fused).  Result goes to VMEM scratch so the
    #      unrolled loop reads aligned per-step slabs.
    xp_ref[...] = (jnp.dot(x_ref[...], wih_ref[...],
                           preferred_element_type=jnp.float32)
                   + b_ref[...])                                    # [Tc*Bp, 4H] f32

    whh = whh_ref[...]                                              # [H, 4H] f32, resident
    h = h_ref[...]
    c = c_ref[...]

    # ---- Phase 2: recurrence.  Tc is static & small -> fully unrolled; each per-step
    #      slab is a sublane-aligned [Bp, 4H] view (Bp is a multiple of 8).
    # NOTE(perf): at larger H, whh could be held MXU-resident across steps via
    # pltpu.matmul_push_rhs / matmul_acc_lhs / matmul_pop; at (Bp, H) = (16, 16) the
    # plain dot is already a single MXU pass per step.
    for t in range(Tc):                                             # static unroll
        gates = xp_ref[t * Bp:(t + 1) * Bp, :] + jnp.dot(
            h, whh, preferred_element_type=jnp.float32)             # [Bp, 4H] f32
        sig = jax.nn.sigmoid(gates[:, :3 * H])                      # one EUP pass: i|f|o
        i_g = sig[:, 0 * H:1 * H]
        f_g = sig[:, 1 * H:2 * H]
        o_g = sig[:, 2 * H:3 * H]
        g_g = jnp.tanh(gates[:, 3 * H:4 * H])                       # one EUP pass: g
        c = f_g * c + i_g * g_g
        h = o_g * jnp.tanh(c)

    h_ref[...] = h
    c_ref[...] = c

    # ---- Phase 3 (last chunk only): last hidden -> Linear -> Softmax(dim=1).
    #      Output columns padded to a lane-dense 128 tile; padded columns carry a
    #      -1e30 bias so they contribute exactly 0 to the softmax.
    @pl.when(chunk == pl.num_programs(0) - 1)
    def _():
        logits = (jnp.dot(h.astype(wlin_ref.dtype), wlin_ref[...],
                          preferred_element_type=jnp.float32)
                  + blin_ref[...])                                  # [Bp, OutP] f32
        m = jnp.max(logits, axis=1, keepdims=True)
        e = jnp.exp(logits - m)
        out_ref[...] = e / jnp.sum(e, axis=1, keepdims=True)        # exact divide


def temporal_lstm_forward(x, params, *, use_bf16_matmul=True, seq_chunk=None):
    """x: [B, T, input_dim] float32 (batch_first, like the PyTorch module).

    use_bf16_matmul: bf16 MXU operands (f32 accumulate) for the hoisted projection and
    the final linear; the recurrent matmul always stays f32.
    seq_chunk: timesteps per grid step (must divide T); None -> whole sequence.
    """
    B, T, D = x.shape
    H = params["w_hh"].shape[1]
    out_dim = params["w_lin"].shape[0]

    mm_dtype = jnp.bfloat16 if use_bf16_matmul else jnp.float32
    sublane = 16 if use_bf16_matmul else 8          # sublane tile of the x operand dtype
    Bp = _round_up(B, sublane)                      # padded batch -> full-tile slabs
    OutP = _round_up(out_dim, 128)                  # lane-dense output store
    Tc = T if seq_chunk is None else seq_chunk
    assert T % Tc == 0, "seq_chunk must divide T"
    n_chunks = T // Tc

    def reorder(w):
        # PyTorch gate row order (i, f, g, o) -> (i, f, o, g) so sigmoid/tanh each act
        # on one contiguous slice inside the kernel.
        i, f, g, o = jnp.split(w, 4, axis=0)
        return jnp.concatenate([i, f, o, g], axis=0)

    # ---- wrapper-side glue (tiny arrays; not the hot path) -----------------------
    # Pad batch to the sublane tile, go time-major, flatten to [T*Bp, D].
    # NOTE(perf): at production sizes this transpose should be replaced by a BlockSpec
    # index_map over the original [B, T, D] layout (or a producer that already emits
    # time-major x) so no extra HBM round-trip is paid.
    x_pad = jnp.zeros((Bp, T, D), x.dtype).at[:B].set(x)
    x_tm = jnp.transpose(x_pad, (1, 0, 2)).reshape(T * Bp, D).astype(mm_dtype)

    wih_t = jnp.transpose(reorder(params["w_ih"])).astype(mm_dtype)        # [D, 4H]
    # Recurrent weights stay f32 (see header note).
    whh_t = jnp.transpose(reorder(params["w_hh"])).astype(jnp.float32)     # [H, 4H]
    b = reorder(params["b_ih"] + params["b_hh"]).reshape(1, 4 * H).astype(jnp.float32)

    wlin_t = jnp.zeros((H, OutP), mm_dtype).at[:, :out_dim].set(
        jnp.transpose(params["w_lin"]).astype(mm_dtype))                   # [H, OutP]
    blin = jnp.full((1, OutP), -1e30, jnp.float32).at[0, :out_dim].set(
        params["b_lin"].astype(jnp.float32))                               # [1, OutP]

    kernel = functools.partial(_lstm_kernel, seq_chunk=Tc, batch=Bp, hidden_dim=H)

    # ---- VMEM budget derived from actual (tile-padded, double-buffered) buffers.
    def tile_bytes(shape, dtype):
        dims = list(shape)
        dims[-1] = _round_up(dims[-1], 128)
        if len(dims) >= 2:
            dims[-2] = _round_up(dims[-2], 8)
        n = 1
        for d in dims:
            n *= d
        return n * jnp.dtype(dtype).itemsize

    buf_bytes = (
        2 * tile_bytes((Tc * Bp, D), mm_dtype)          # streamed x chunk (double-buffered)
        + 2 * (tile_bytes((D, 4 * H), mm_dtype)
               + tile_bytes((H, 4 * H), jnp.float32)
               + tile_bytes((1, 4 * H), jnp.float32)
               + tile_bytes((H, OutP), mm_dtype)
               + tile_bytes((1, OutP), jnp.float32))    # resident weights / biases
        + 2 * tile_bytes((Bp, OutP), jnp.float32)       # output block
        + tile_bytes((Tc * Bp, 4 * H), jnp.float32)     # x_proj scratch
        + 2 * tile_bytes((Bp, H), jnp.float32)          # h, c scratch
    )
    # 2x headroom for compiler temporaries; cap at 64 MiB so the same budget also
    # holds on v7x (64 MiB/TC), well inside v5e/v6e's 128 MiB.
    vmem_limit = int(min(max(2 * buf_bytes, 4 * 1024 * 1024), 64 * 1024 * 1024))

    flops = (2 * T * Bp * D * 4 * H            # hoisted input projection
             + 2 * T * Bp * H * 4 * H          # recurrent matmuls
             + 2 * Bp * H * OutP               # final linear
             + 10 * T * Bp * H)                # elementwise gate math
    transcendentals = T * Bp * 5 * H + Bp * OutP
    bytes_accessed = (x_tm.size * x_tm.dtype.itemsize
                      + wih_t.size * wih_t.dtype.itemsize
                      + whh_t.size * whh_t.dtype.itemsize
                      + b.size * 4
                      + wlin_t.size * wlin_t.dtype.itemsize
                      + blin.size * 4
                      + Bp * OutP * 4)

    grid_spec = pltpu.PrefetchScalarGridSpec(
        num_scalar_prefetch=0,
        grid=(n_chunks,),
        in_specs=[
            pl.BlockSpec((Tc * Bp, D), lambda i: (i, 0)),       # x: streamed per chunk
            pl.BlockSpec((D, 4 * H), lambda i: (0, 0)),         # w_ih: resident
            pl.BlockSpec((H, 4 * H), lambda i: (0, 0)),         # w_hh: resident
            pl.BlockSpec((1, 4 * H), lambda i: (0, 0)),         # fused bias: resident
            pl.BlockSpec((H, OutP), lambda i: (0, 0)),          # w_lin: resident
            pl.BlockSpec((1, OutP), lambda i: (0, 0)),          # b_lin: resident
        ],
        out_specs=pl.BlockSpec((Bp, OutP), lambda i: (0, 0)),
        scratch_shapes=[
            pltpu.VMEM((Tc * Bp, 4 * H), jnp.float32),          # per-chunk x projection
            pltpu.VMEM((Bp, H), jnp.float32),                   # h (carried across chunks)
            pltpu.VMEM((Bp, H), jnp.float32),                   # c (carried across chunks)
        ],
    )

    out_padded = pl.pallas_call(
        kernel,
        out_shape=jax.ShapeDtypeStruct((Bp, OutP), jnp.float32),
        grid_spec=grid_spec,
        compiler_params=pltpu.CompilerParams(
            dimension_semantics=("arbitrary",),                  # carried recurrence
            vmem_limit_bytes=vmem_limit),
        cost_estimate=pl.CostEstimate(flops=flops,
                                      transcendentals=transcendentals,
                                      bytes_accessed=bytes_accessed),
    )(x_tm, wih_t, whh_t, b, wlin_t, blin)

    return out_padded[:B, :out_dim]


def _reference_forward(x, params):
    """Pure-JAX reference replicating torch.nn.LSTM + Linear + Softmax(dim=1)."""
    H = params["w_hh"].shape[1]
    B, T, D = x.shape
    h = jnp.zeros((B, H), jnp.float32)
    c = jnp.zeros((B, H), jnp.float32)
    wih, whh = params["w_ih"], params["w_hh"]
    b = params["b_ih"] + params["b_hh"]
    for t in range(T):
        gates = x[:, t, :] @ wih.T + h @ whh.T + b
        i = jax.nn.sigmoid(gates[:, 0 * H:1 * H])
        f = jax.nn.sigmoid(gates[:, 1 * H:2 * H])
        g = jnp.tanh(gates[:, 2 * H:3 * H])
        o = jax.nn.sigmoid(gates[:, 3 * H:4 * H])
        c = f * c + i * g
        h = o * jnp.tanh(c)
    logits = h @ params["w_lin"].T + params["b_lin"]
    return jax.nn.softmax(logits, axis=1)


def _init_params(key, input_dim, hidden_dim, output_dim):
    """Deterministic init mimicking PyTorch's U(-1/sqrt(H), 1/sqrt(H))."""
    ks = jax.random.split(key, 6)
    s = 1.0 / jnp.sqrt(hidden_dim)
    u = lambda k, shape: jax.random.uniform(k, shape, jnp.float32, -s, s)
    return {
        "w_ih": u(ks[0], (4 * hidden_dim, input_dim)),
        "w_hh": u(ks[1], (4 * hidden_dim, hidden_dim)),
        "b_ih": u(ks[2], (4 * hidden_dim,)),
        "b_hh": u(ks[3], (4 * hidden_dim,)),
        "w_lin": u(ks[4], (output_dim, hidden_dim)),
        "b_lin": u(ks[5], (output_dim,)),
    }


if __name__ == "__main__":
    input_dim, hidden_dim, output_dim = 7, 16, 7
    B, T = 2, 8

    key = jax.random.PRNGKey(0)
    kx, kp = jax.random.split(key)
    x = jax.random.normal(kx, (B, T, input_dim), jnp.float32)
    params = _init_params(kp, input_dim, hidden_dim, output_dim)

    ref = _reference_forward(x, params)

    # Default path: bf16 MXU operands (f32 accumulate) for projection + final linear.
    out_bf16 = jax.block_until_ready(temporal_lstm_forward(x, params))
    assert out_bf16.shape == (B, output_dim)
    assert jnp.allclose(jnp.sum(out_bf16, axis=1), 1.0, atol=1e-4)   # exact softmax rows
    assert jnp.allclose(out_bf16, ref, atol=2e-2, rtol=2e-2), (out_bf16, ref)

    # Full-f32 path: tight check against the f32 reference.
    out_f32 = jax.block_until_ready(
        temporal_lstm_forward(x, params, use_bf16_matmul=False))
    assert out_f32.shape == (B, output_dim)
    assert jnp.allclose(out_f32, ref, atol=1e-3, rtol=1e-3), (out_f32, ref)

    print("KERNEL_OK")
</pallas_src>

<mosaic_0001>
module attributes {stable_mosaic.version = 11 : i64} {
  func.func @_lstm_kernel(%arg0: i32, %arg1: memref<128x7xbf16, #tpu.memory_space<vmem>>, %arg2: memref<7x64xbf16, #tpu.memory_space<vmem>>, %arg3: memref<16x64xf32, #tpu.memory_space<vmem>>, %arg4: memref<1x64xf32, #tpu.memory_space<vmem>>, %arg5: memref<16x128xbf16, #tpu.memory_space<vmem>>, %arg6: memref<1x128xf32, #tpu.memory_space<vmem>>, %arg7: memref<16x128xf32, #tpu.memory_space<vmem>>, %arg8: memref<128x64xf32, #tpu.memory_space<vmem>>, %arg9: memref<16x16xf32, #tpu.memory_space<vmem>>, %arg10: memref<16x16xf32, #tpu.memory_space<vmem>>) attributes {dimension_semantics = [#tpu.dimension_semantics<arbitrary>], iteration_bounds = array<i64: 1>, scalar_prefetch = 0 : i64, scratch_operands = 3 : i64, tpu.core_type = #tpu.core_type<tc>, window_params = [{transform_indices = @transform_0, window_bounds = array<i64: 128, 7>}, {pipeline_mode = #tpu.pipeline_mode<synchronous>, transform_indices = @transform_1, window_bounds = array<i64: 7, 64>}, {pipeline_mode = #tpu.pipeline_mode<synchronous>, transform_indices = @transform_2, window_bounds = array<i64: 16, 64>}, {pipeline_mode = #tpu.pipeline_mode<synchronous>, transform_indices = @transform_3, window_bounds = array<i64: 1, 64>}, {pipeline_mode = #tpu.pipeline_mode<synchronous>, transform_indices = @transform_4, window_bounds = array<i64: 16, 128>}, {pipeline_mode = #tpu.pipeline_mode<synchronous>, transform_indices = @transform_5, window_bounds = array<i64: 1, 128>}, {pipeline_mode = #tpu.pipeline_mode<synchronous>, transform_indices = @transform_6, window_bounds = array<i64: 16, 128>}]} {
    %c0_i32 = arith.constant 0 : i32
    %0 = arith.cmpi eq, %arg0, %c0_i32 : i32
    %1 = arith.extui %0 : i1 to i32
    %c0_i32_0 = arith.constant 0 : i32
    %2 = arith.cmpi ne, %1, %c0_i32_0 : i32
    scf.if %2 {
      %cst_45 = arith.constant 0.000000e+00 : f32
      %170 = vector.broadcast %cst_45 : f32 to vector<16x16xf32>
      %c0_46 = arith.constant 0 : index
      %c0_47 = arith.constant 0 : index
      %171 = vector.load %arg9[%c0_46, %c0_47] : memref<16x16xf32, #tpu.memory_space<vmem>>, vector<16x16xf32>
      tpu.vector_store %arg9[%c0_46, %c0_47], %170 {strides = array<i32>} : memref<16x16xf32, #tpu.memory_space<vmem>>, vector<16x16xf32>,
      %cst_48 = arith.constant 0.000000e+00 : f32
      %172 = vector.broadcast %cst_48 : f32 to vector<16x16xf32>
      %c0_49 = arith.constant 0 : index
      %c0_50 = arith.constant 0 : index
      %173 = vector.load %arg10[%c0_49, %c0_50] : memref<16x16xf32, #tpu.memory_space<vmem>>, vector<16x16xf32>
      tpu.vector_store %arg10[%c0_49, %c0_50], %172 {strides = array<i32>} : memref<16x16xf32, #tpu.memory_space<vmem>>, vector<16x16xf32>,
    } else {
    }
    %c0 = arith.constant 0 : index
    %c0_1 = arith.constant 0 : index
    %3 = vector.load %arg1[%c0, %c0_1] : memref<128x7xbf16, #tpu.memory_space<vmem>>, vector<128x7xbf16>
    %c0_2 = arith.constant 0 : index
    %c0_3 = arith.constant 0 : index
    %4 = vector.load %arg2[%c0_2, %c0_3] : memref<7x64xbf16, #tpu.memory_space<vmem>>, vector<7x64xbf16>
    %cst = arith.constant dense<0.000000e+00> : vector<128x64xf32>
    %5 = tpu.matmul %3, %4, %cst {dimension_numbers = #tpu.dot_dimension_numbers<[1], [0], [0], [1], [0, 0, 1, 1], [], []>} : vector<128x7xbf16>, vector<7x64xbf16>, vector<128x64xf32> -> vector<128x64xf32>
    %c0_4 = arith.constant 0 : index
    %c0_5 = arith.constant 0 : index
    %6 = vector.load %arg4[%c0_4, %c0_5] : memref<1x64xf32, #tpu.memory_space<vmem>>, vector<1x64xf32>
    %7 = vector.broadcast %6 : vector<1x64xf32> to vector<128x64xf32>
    %8 = arith.addf %5, %7 : vector<128x64xf32>
    %c0_6 = arith.constant 0 : index
    %c0_7 = arith.constant 0 : index
    %9 = vector.load %arg8[%c0_6, %c0_7] : memref<128x64xf32, #tpu.memory_space<vmem>>, vector<128x64xf32>
    tpu.vector_store %arg8[%c0_6, %c0_7], %8 {strides = array<i32>} : memref<128x64xf32, #tpu.memory_space<vmem>>, vector<128x64xf32>,
    %c0_8 = arith.constant 0 : index
    %c0_9 = arith.constant 0 : index
    %10 = vector.load %arg3[%c0_8, %c0_9] : memref<16x64xf32, #tpu.memory_space<vmem>>, vector<16x64xf32>
    %c0_10 = arith.constant 0 : index
    %c0_11 = arith.constant 0 : index
    %11 = vector.load %arg9[%c0_10, %c0_11] : memref<16x16xf32, #tpu.memory_space<vmem>>, vector<16x16xf32>
    %c0_12 = arith.constant 0 : index
    %c0_13 = arith.constant 0 : index
    %12 = vector.load %arg10[%c0_12, %c0_13] : memref<16x16xf32, #tpu.memory_space<vmem>>, vector<16x16xf32>
    %c0_14 = arith.constant 0 : index
    %c0_15 = arith.constant 0 : index
    %13 = vector.load %arg8[%c0_14, %c0_15] : memref<128x64xf32, #tpu.memory_space<vmem>>, vector<16x64xf32>
    %cst_16 = arith.constant dense<0.000000e+00> : vector<16x64xf32>
    %14 = tpu.matmul %11, %10, %cst_16 {dimension_numbers = #tpu.dot_dimension_numbers<[1], [0], [0], [1], [0, 0, 1, 1], [], []>} : vector<16x16xf32>, vector<16x64xf32>, vector<16x64xf32> -> vector<16x64xf32>
    %15 = arith.addf %13, %14 : vector<16x64xf32>
    %16 = vector.extract_strided_slice %15 {offsets = [0, 0], sizes = [16, 48], strides = [1, 1]} : vector<16x64xf32> to vector<16x48xf32>
    %17 = arith.negf %16 : vector<16x48xf32>
    %18 = math.exp %17 : vector<16x48xf32>
    %cst_17 = arith.constant 1.000000e+00 : f32
    %19 = vector.broadcast %cst_17 : f32 to vector<16x48xf32>
    %20 = arith.addf %19, %18 : vector<16x48xf32>
    %21 = arith.divf %19, %20 : vector<16x48xf32>
    %22 = vector.extract_strided_slice %21 {offsets = [0, 0], sizes = [16, 16], strides = [1, 1]} : vector<16x48xf32> to vector<16x16xf32>
    %23 = vector.extract_strided_slice %21 {offsets = [0, 16], sizes = [16, 16], strides = [1, 1]} : vector<16x48xf32> to vector<16x16xf32>
    %24 = vector.extract_strided_slice %21 {offsets = [0, 32], sizes = [16, 16], strides = [1, 1]} : vector<16x48xf32> to vector<16x16xf32>
    %25 = vector.extract_strided_slice %15 {offsets = [0, 48], sizes = [16, 16], strides = [1, 1]} : vector<16x64xf32> to vector<16x16xf32>
    %26 = math.tanh %25 : vector<16x16xf32>
    %27 = arith.mulf %23, %12 : vector<16x16xf32>
    %28 = arith.mulf %22, %26 : vector<16x16xf32>
    %29 = arith.addf %27, %28 : vector<16x16xf32>
    %30 = math.tanh %29 : vector<16x16xf32>
    %31 = arith.mulf %24, %30 : vector<16x16xf32>
    %c16 = arith.constant 16 : index
    %c0_18 = arith.constant 0 : index
    %32 = vector.load %arg8[%c16, %c0_18] : memref<128x64xf32, #tpu.memory_space<vmem>>, vector<16x64xf32>
    %cst_19 = arith.constant dense<0.000000e+00> : vector<16x64xf32>
    %33 = tpu.matmul %31, %10, %cst_19 {dimension_numbers = #tpu.dot_dimension_numbers<[1], [0], [0], [1], [0, 0, 1, 1], [], []>} : vector<16x16xf32>, vector<16x64xf32>, vector<16x64xf32> -> vector<16x64xf32>
    %34 = arith.addf %32, %33 : vector<16x64xf32>
    %35 = vector.extract_strided_slice %34 {offsets = [0, 0], sizes = [16, 48], strides = [1, 1]} : vector<16x64xf32> to vector<16x48xf32>
    %36 = arith.negf %35 : vector<16x48xf32>
    %37 = math.exp %36 : vector<16x48xf32>
    %cst_20 = arith.constant 1.000000e+00 : f32
    %38 = vector.broadcast %cst_20 : f32 to vector<16x48xf32>
    %39 = arith.addf %38, %37 : vector<16x48xf32>
    %40 = arith.divf %38, %39 : vector<16x48xf32>
    %41 = vector.extract_strided_slice %40 {offsets = [0, 0], sizes = [16, 16], strides = [1, 1]} : vector<16x48xf32> to vector<16x16xf32>
    %42 = vector.extract_strided_slice %40 {offsets = [0, 16], sizes = [16, 16], strides = [1, 1]} : vector<16x48xf32> to vector<16x16xf32>
    %43 = vector.extract_strided_slice %40 {offsets = [0, 32], sizes = [16, 16], strides = [1, 1]} : vector<16x48xf32> to vector<16x16xf32>
    %44 = vector.extract_strided_slice %34 {offsets = [0, 48], sizes = [16, 16], strides = [1, 1]} : vector<16x64xf32> to vector<16x16xf32>
    %45 = math.tanh %44 : vector<16x16xf32>
    %46 = arith.mulf %42, %29 : vector<16x16xf32>
    %47 = arith.mulf %41, %45 : vector<16x16xf32>
    %48 = arith.addf %46, %47 : vector<16x16xf32>
    %49 = math.tanh %48 : vector<16x16xf32>
    %50 = arith.mulf %43, %49 : vector<16x16xf32>
    %c32 = arith.constant 32 : index
    %c0_21 = arith.constant 0 : index
    %51 = vector.load %arg8[%c32, %c0_21] : memref<128x64xf32, #tpu.memory_space<vmem>>, vector<16x64xf32>
    %cst_22 = arith.constant dense<0.000000e+00> : vector<16x64xf32>
    %52 = tpu.matmul %50, %10, %cst_22 {dimension_numbers = #tpu.dot_dimension_numbers<[1], [0], [0], [1], [0, 0, 1, 1], [], []>} : vector<16x16xf32>, vector<16x64xf32>, vector<16x64xf32> -> vector<16x64xf32>
    %53 = arith.addf %51, %52 : vector<16x64xf32>
    %54 = vector.extract_strided_slice %53 {offsets = [0, 0], sizes = [16, 48], strides = [1, 1]} : vector<16x64xf32> to vector<16x48xf32>
    %55 = arith.negf %54 : vector<16x48xf32>
    %56 = math.exp %55 : vector<16x48xf32>
    %cst_23 = arith.constant 1.000000e+00 : f32
    %57 = vector.broadcast %cst_23 : f32 to vector<16x48xf32>
    %58 = arith.addf %57, %56 : vector<16x48xf32>
    %59 = arith.divf %57, %58 : vector<16x48xf32>
    %60 = vector.extract_strided_slice %59 {offsets = [0, 0], sizes = [16, 16], strides = [1, 1]} : vector<16x48xf32> to vector<16x16xf32>
    %61 = vector.extract_strided_slice %59 {offsets = [0, 16], sizes = [16, 16], strides = [1, 1]} : vector<16x48xf32> to vector<16x16xf32>
    %62 = vector.extract_strided_slice %59 {offsets = [0, 32], sizes = [16, 16], strides = [1, 1]} : vector<16x48xf32> to vector<16x16xf32>
    %63 = vector.extract_strided_slice %53 {offsets = [0, 48], sizes = [16, 16], strides = [1, 1]} : vector<16x64xf32> to vector<16x16xf32>
    %64 = math.tanh %63 : vector<16x16xf32>
    %65 = arith.mulf %61, %48 : vector<16x16xf32>
    %66 = arith.mulf %60, %64 : vector<16x16xf32>
    %67 = arith.addf %65, %66 : vector<16x16xf32>
    %68 = math.tanh %67 : vector<16x16xf32>
    %69 = arith.mulf %62, %68 : vector<16x16xf32>
    %c48 = arith.constant 48 : index
    %c0_24 = arith.constant 0 : index
    %70 = vector.load %arg8[%c48, %c0_24] : memref<128x64xf32, #tpu.memory_space<vmem>>, vector<16x64xf32>
    %cst_25 = arith.constant dense<0.000000e+00> : vector<16x64xf32>
    %71 = tpu.matmul %69, %10, %cst_25 {dimension_numbers = #tpu.dot_dimension_numbers<[1], [0], [0], [1], [0, 0, 1, 1], [], []>} : vector<16x16xf32>, vector<16x64xf32>, vector<16x64xf32> -> vector<16x64xf32>
    %72 = arith.addf %70, %71 : vector<16x64xf32>
    %73 = vector.extract_strided_slice %72 {offsets = [0, 0], sizes = [16, 48], strides = [1, 1]} : vector<16x64xf32> to vector<16x48xf32>
    %74 = arith.negf %73 : vector<16x48xf32>
    %75 = math.exp %74 : vector<16x48xf32>
    %cst_26 = arith.constant 1.000000e+00 : f32
    %76 = vector.broadcast %cst_26 : f32 to vector<16x48xf32>
    %77 = arith.addf %76, %75 : vector<16x48xf32>
    %78 = arith.divf %76, %77 : vector<16x48xf32>
    %79 = vector.extract_strided_slice %78 {offsets = [0, 0], sizes = [16, 16], strides = [1, 1]} : vector<16x48xf32> to vector<16x16xf32>
    %80 = vector.extract_strided_slice %78 {offsets = [0, 16], sizes = [16, 16], strides = [1, 1]} : vector<16x48xf32> to vector<16x16xf32>
    %81 = vector.extract_strided_slice %78 {offsets = [0, 32], sizes = [16, 16], strides = [1, 1]} : vector<16x48xf32> to vector<16x16xf32>
    %82 = vector.extract_strided_slice %72 {offsets = [0, 48], sizes = [16, 16], strides = [1, 1]} : vector<16x64xf32> to vector<16x16xf32>
    %83 = math.tanh %82 : vector<16x16xf32>
    %84 = arith.mulf %80, %67 : vector<16x16xf32>
    %85 = arith.mulf %79, %83 : vector<16x16xf32>
    %86 = arith.addf %84, %85 : vector<16x16xf32>
    %87 = math.tanh %86 : vector<16x16xf32>
    %88 = arith.mulf %81, %87 : vector<16x16xf32>
    %c64 = arith.constant 64 : index
    %c0_27 = arith.constant 0 : index
    %89 = vector.load %arg8[%c64, %c0_27] : memref<128x64xf32, #tpu.memory_space<vmem>>, vector<16x64xf32>
    %cst_28 = arith.constant dense<0.000000e+00> : vector<16x64xf32>
    %90 = tpu.matmul %88, %10, %cst_28 {dimension_numbers = #tpu.dot_dimension_numbers<[1], [0], [0], [1], [0, 0, 1, 1], [], []>} : vector<16x16xf32>, vector<16x64xf32>, vector<16x64xf32> -> vector<16x64xf32>
    %91 = arith.addf %89, %90 : vector<16x64xf32>
    %92 = vector.extract_strided_slice %91 {offsets = [0, 0], sizes = [16, 48], strides = [1, 1]} : vector<16x64xf32> to vector<16x48xf32>
    %93 = arith.negf %92 : vector<16x48xf32>
    %94 = math.exp %93 : vector<16x48xf32>
    %cst_29 = arith.constant 1.000000e+00 : f32
    %95 = vector.broadcast %cst_29 : f32 to vector<16x48xf32>
    %96 = arith.addf %95, %94 : vector<16x48xf32>
    %97 = arith.divf %95, %96 : vector<16x48xf32>
    %98 = vector.extract_strided_slice %97 {offsets = [0, 0], sizes = [16, 16], strides = [1, 1]} : vector<16x48xf32> to vector<16x16xf32>
    %99 = vector.extract_strided_slice %97 {offsets = [0, 16], sizes = [16, 16], strides = [1, 1]} : vector<16x48xf32> to vector<16x16xf32>
    %100 = vector.extract_strided_slice %97 {offsets = [0, 32], sizes = [16, 16], strides = [1, 1]} : vector<16x48xf32> to vector<16x16xf32>
    %101 = vector.extract_strided_slice %91 {offsets = [0, 48], sizes = [16, 16], strides = [1, 1]} : vector<16x64xf32> to vector<16x16xf32>
    %102 = math.tanh %101 : vector<16x16xf32>
    %103 = arith.mulf %99, %86 : vector<16x16xf32>
    %104 = arith.mulf %98, %102 : vector<16x16xf32>
    %105 = arith.addf %103, %104 : vector<16x16xf32>
    %106 = math.tanh %105 : vector<16x16xf32>
    %107 = arith.mulf %100, %106 : vector<16x16xf32>
    %c80 = arith.constant 80 : index
    %c0_30 = arith.constant 0 : index
    %108 = vector.load %arg8[%c80, %c0_30] : memref<128x64xf32, #tpu.memory_space<vmem>>, vector<16x64xf32>
    %cst_31 = arith.constant dense<0.000000e+00> : vector<16x64xf32>
    %109 = tpu.matmul %107, %10, %cst_31 {dimension_numbers = #tpu.dot_dimension_numbers<[1], [0], [0], [1], [0, 0, 1, 1], [], []>} : vector<16x16xf32>, vector<16x64xf32>, vector<16x64xf32> -> vector<16x64xf32>
    %110 = arith.addf %108, %109 : vector<16x64xf32>
    %111 = vector.extract_strided_slice %110 {offsets = [0, 0], sizes = [16, 48], strides = [1, 1]} : vector<16x64xf32> to vector<16x48xf32>
    %112 = arith.negf %111 : vector<16x48xf32>
    %113 = math.exp %112 : vector<16x48xf32>
    %cst_32 = arith.constant 1.000000e+00 : f32
    %114 = vector.broadcast %cst_32 : f32 to vector<16x48xf32>
    %115 = arith.addf %114, %113 : vector<16x48xf32>
    %116 = arith.divf %114, %115 : vector<16x48xf32>
    %117 = vector.extract_strided_slice %116 {offsets = [0, 0], sizes = [16, 16], strides = [1, 1]} : vector<16x48xf32> to vector<16x16xf32>
    %118 = vector.extract_strided_slice %116 {offsets = [0, 16], sizes = [16, 16], strides = [1, 1]} : vector<16x48xf32> to vector<16x16xf32>
    %119 = vector.extract_strided_slice %116 {offsets = [0, 32], sizes = [16, 16], strides = [1, 1]} : vector<16x48xf32> to vector<16x16xf32>
    %120 = vector.extract_strided_slice %110 {offsets = [0, 48], sizes = [16, 16], strides = [1, 1]} : vector<16x64xf32> to vector<16x16xf32>
    %121 = math.tanh %120 : vector<16x16xf32>
    %122 = arith.mulf %118, %105 : vector<16x16xf32>
    %123 = arith.mulf %117, %121 : vector<16x16xf32>
    %124 = arith.addf %122, %123 : vector<16x16xf32>
    %125 = math.tanh %124 : vector<16x16xf32>
    %126 = arith.mulf %119, %125 : vector<16x16xf32>
    %c96 = arith.constant 96 : index
    %c0_33 = arith.constant 0 : index
    %127 = vector.load %arg8[%c96, %c0_33] : memref<128x64xf32, #tpu.memory_space<vmem>>, vector<16x64xf32>
    %cst_34 = arith.constant dense<0.000000e+00> : vector<16x64xf32>
    %128 = tpu.matmul %126, %10, %cst_34 {dimension_numbers = #tpu.dot_dimension_numbers<[1], [0], [0], [1], [0, 0, 1, 1], [], []>} : vector<16x16xf32>, vector<16x64xf32>, vector<16x64xf32> -> vector<16x64xf32>
    %129 = arith.addf %127, %128 : vector<16x64xf32>
    %130 = vector.extract_strided_slice %129 {offsets = [0, 0], sizes = [16, 48], strides = [1, 1]} : vector<16x64xf32> to vector<16x48xf32>
    %131 = arith.negf %130 : vector<16x48xf32>
    %132 = math.exp %131 : vector<16x48xf32>
    %cst_35 = arith.constant 1.000000e+00 : f32
    %133 = vector.broadcast %cst_35 : f32 to vector<16x48xf32>
    %134 = arith.addf %133, %132 : vector<16x48xf32>
    %135 = arith.divf %133, %134 : vector<16x48xf32>
    %136 = vector.extract_strided_slice %135 {offsets = [0, 0], sizes = [16, 16], strides = [1, 1]} : vector<16x48xf32> to vector<16x16xf32>
    %137 = vector.extract_strided_slice %135 {offsets = [0, 16], sizes = [16, 16], strides = [1, 1]} : vector<16x48xf32> to vector<16x16xf32>
    %138 = vector.extract_strided_slice %135 {offsets = [0, 32], sizes = [16, 16], strides = [1, 1]} : vector<16x48xf32> to vector<16x16xf32>
    %139 = vector.extract_strided_slice %129 {offsets = [0, 48], sizes = [16, 16], strides = [1, 1]} : vector<16x64xf32> to vector<16x16xf32>
    %140 = math.tanh %139 : vector<16x16xf32>
    %141 = arith.mulf %137, %124 : vector<16x16xf32>
    %142 = arith.mulf %136, %140 : vector<16x16xf32>
    %143 = arith.addf %141, %142 : vector<16x16xf32>
    %144 = math.tanh %143 : vector<16x16xf32>
    %145 = arith.mulf %138, %144 : vector<16x16xf32>
    %c112 = arith.constant 112 : index
    %c0_36 = arith.constant 0 : index
    %146 = vector.load %arg8[%c112, %c0_36] : memref<128x64xf32, #tpu.memory_space<vmem>>, vector<16x64xf32>
    %cst_37 = arith.constant dense<0.000000e+00> : vector<16x64xf32>
    %147 = tpu.matmul %145, %10, %cst_37 {dimension_numbers = #tpu.dot_dimension_numbers<[1], [0], [0], [1], [0, 0, 1, 1], [], []>} : vector<16x16xf32>, vector<16x64xf32>, vector<16x64xf32> -> vector<16x64xf32>
    %148 = arith.addf %146, %147 : vector<16x64xf32>
    %149 = vector.extract_strided_slice %148 {offsets = [0, 0], sizes = [16, 48], strides = [1, 1]} : vector<16x64xf32> to vector<16x48xf32>
    %150 = arith.negf %149 : vector<16x48xf32>
    %151 = math.exp %150 : vector<16x48xf32>
    %cst_38 = arith.constant 1.000000e+00 : f32
    %152 = vector.broadcast %cst_38 : f32 to vector<16x48xf32>
    %153 = arith.addf %152, %151 : vector<16x48xf32>
    %154 = arith.divf %152, %153 : vector<16x48xf32>
    %155 = vector.extract_strided_slice %154 {offsets = [0, 0], sizes = [16, 16], strides = [1, 1]} : vector<16x48xf32> to vector<16x16xf32>
    %156 = vector.extract_strided_slice %154 {offsets = [0, 16], sizes = [16, 16], strides = [1, 1]} : vector<16x48xf32> to vector<16x16xf32>
    %157 = vector.extract_strided_slice %154 {offsets = [0, 32], sizes = [16, 16], strides = [1, 1]} : vector<16x48xf32> to vector<16x16xf32>
    %158 = vector.extract_strided_slice %148 {offsets = [0, 48], sizes = [16, 16], strides = [1, 1]} : vector<16x64xf32> to vector<16x16xf32>
    %159 = math.tanh %158 : vector<16x16xf32>
    %160 = arith.mulf %156, %143 : vector<16x16xf32>
    %161 = arith.mulf %155, %159 : vector<16x16xf32>
    %162 = arith.addf %160, %161 : vector<16x16xf32>
    %163 = math.tanh %162 : vector<16x16xf32>
    %164 = arith.mulf %157, %163 : vector<16x16xf32>
    %c0_39 = arith.constant 0 : index
    %c0_40 = arith.constant 0 : index
    %165 = vector.load %arg9[%c0_39, %c0_40] : memref<16x16xf32, #tpu.memory_space<vmem>>, vector<16x16xf32>
    tpu.vector_store %arg9[%c0_39, %c0_40], %164 {strides = array<i32>} : memref<16x16xf32, #tpu.memory_space<vmem>>, vector<16x16xf32>,
    %c0_41 = arith.constant 0 : index
    %c0_42 = arith.constant 0 : index
    %166 = vector.load %arg10[%c0_41, %c0_42] : memref<16x16xf32, #tpu.memory_space<vmem>>, vector<16x16xf32>
    tpu.vector_store %arg10[%c0_41, %c0_42], %162 {strides = array<i32>} : memref<16x16xf32, #tpu.memory_space<vmem>>, vector<16x16xf32>,
    %c0_i32_43 = arith.constant 0 : i32
    %167 = arith.cmpi eq, %arg0, %c0_i32_43 : i32
    %168 = arith.extui %167 : i1 to i32
    %c0_i32_44 = arith.constant 0 : i32
    %169 = arith.cmpi ne, %168, %c0_i32_44 : i32
    scf.if %169 {
      %170 = arith.truncf %164 : vector<16x16xf32> to vector<16x16xbf16>
      %c0_45 = arith.constant 0 : index
      %c0_46 = arith.constant 0 : index
      %171 = vector.load %arg5[%c0_45, %c0_46] : memref<16x128xbf16, #tpu.memory_space<vmem>>, vector<16x128xbf16>
      %cst_47 = arith.constant dense<0.000000e+00> : vector<16x128xf32>
      %172 = tpu.matmul %170, %171, %cst_47 {dimension_numbers = #tpu.dot_dimension_numbers<[1], [0], [0], [1], [0, 0, 1, 1], [], []>} : vector<16x16xbf16>, vector<16x128xbf16>, vector<16x128xf32> -> vector<16x128xf32>
      %c0_48 = arith.constant 0 : index
      %c0_49 = arith.constant 0 : index
      %173 = vector.load %arg6[%c0_48, %c0_49] : memref<1x128xf32, #tpu.memory_space<vmem>>, vector<1x128xf32>
      %174 = vector.broadcast %173 : vector<1x128xf32> to vector<16x128xf32>
      %175 = arith.addf %172, %174 : vector<16x128xf32>
      %cst_50 = arith.constant dense<0xFF800000> : vector<16xf32>
      %176 = vector.multi_reduction <maximumf>, %175, %cst_50 [1] : vector<16x128xf32> to vector<16xf32>
      %177 = vector.shape_cast %176 : vector<16xf32> to vector<16x1xf32>
      %178 = vector.broadcast %177 : vector<16x1xf32> to vector<16x128xf32>
      %179 = arith.subf %175, %178 : vector<16x128xf32>
      %180 = math.exp %179 : vector<16x128xf32>
      %cst_51 = arith.constant dense<0.000000e+00> : vector<16xf32>
      %181 = vector.multi_reduction <add>, %180, %cst_51 [1] : vector<16x128xf32> to vector<16xf32>
      %182 = vector.shape_cast %181 : vector<16xf32> to vector<16x1xf32>
      %183 = vector.broadcast %182 : vector<16x1xf32> to vector<16x128xf32>
      %184 = arith.divf %180, %183 : vector<16x128xf32>
      %c0_52 = arith.constant 0 : index
      %c0_53 = arith.constant 0 : index
      %185 = vector.load %arg7[%c0_52, %c0_53] : memref<16x128xf32, #tpu.memory_space<vmem>>, vector<16x128xf32>
      tpu.vector_store %arg7[%c0_52, %c0_53], %184 {strides = array<i32>} : memref<16x128xf32, #tpu.memory_space<vmem>>, vector<16x128xf32>,
    } else {
    }
    return
  }
  func.func @transform_0(%arg0: i32) -> (i32, i32) {
    %c0_i32 = arith.constant 0 : i32
    %c0_i32_0 = arith.constant 0 : i32
    return %arg0, %c0_i32 : i32, i32
  }
  func.func @transform_1(%arg0: i32) -> (i32, i32) {
    %c0_i32 = arith.constant 0 : i32
    %c0_i32_0 = arith.constant 0 : i32
    %c0_i32_1 = arith.constant 0 : i32
    return %c0_i32, %c0_i32_0 : i32, i32
  }
  func.func @transform_2(%arg0: i32) -> (i32, i32) {
    %c0_i32 = arith.constant 0 : i32
    %c0_i32_0 = arith.constant 0 : i32
    %c0_i32_1 = arith.constant 0 : i32
    return %c0_i32, %c0_i32_0 : i32, i32
  }
  func.func @transform_3(%arg0: i32) -> (i32, i32) {
    %c0_i32 = arith.constant 0 : i32
    %c0_i32_0 = arith.constant 0 : i32
    %c0_i32_1 = arith.constant 0 : i32
    return %c0_i32, %c0_i32_0 : i32, i32
  }
  func.func @transform_4(%arg0: i32) -> (i32, i32) {
    %c0_i32 = arith.constant 0 : i32
    %c0_i32_0 = arith.constant 0 : i32
    %c0_i32_1 = arith.constant 0 : i32
    return %c0_i32, %c0_i32_0 : i32, i32
  }
  func.func @transform_5(%arg0: i32) -> (i32, i32) {
    %c0_i32 = arith.constant 0 : i32
    %c0_i32_0 = arith.constant 0 : i32
    %c0_i32_1 = arith.constant 0 : i32
    return %c0_i32, %c0_i32_0 : i32, i32
  }
  func.func @transform_6(%arg0: i32) -> (i32, i32) {
    %c0_i32 = arith.constant 0 : i32
    %c0_i32_0 = arith.constant 0 : i32
    %c0_i32_1 = arith.constant 0 : i32
    return %c0_i32, %c0_i32_0 : i32, i32
  }
}

</mosaic_0001>

<bundles_post_ra>
// kernel: tpu_custom_call.1
= control target key start
LH: loop header
LB: loop body
LE: loop exit
PB: predicated region body
PF: predicated region fallthrough
CT: control target
= control target key end

     0   :  { %vm120_vm0 = vcmask 1042432   ;;  %vm121_vm1 = vcmask 1043456   ;;  %v1473_v1 = vmov 65535   ;;  %vm29_vm2 = vcmask 130048   ;;  %s1772_s0 = inlined_call_operand.vmem [shape: bf16[128,7], index: 0, kind: input, shape index: {}]   ;;  %s1773_s1 = inlined_call_operand.vmem [shape: bf16[7,64], index: 1, kind: input, shape index: {}]   ;;  %s1774_s2 = inlined_call_operand.vmem [shape: f32[16,64], index: 2, kind: input, shape index: {}]   ;;  %s1775_s3 = inlined_call_operand.vmem [shape: f32[1,64], index: 3, kind: input, shape index: {}]   ;;  %s1776_s4 = inlined_call_operand.vmem [shape: bf16[16,128], index: 4, kind: input, shape index: {}]   ;;  %s1777_s5 = inlined_call_operand.vmem [shape: f32[1,128], index: 5, kind: input, shape index: {}]   ;;  %s1778_s6 = inlined_call_operand.hbm [shape: f32[16,128], index: 6, kind: output, shape index: {}]  }
   0x1   :  { %v50_v0 = vld [vmem:[%s1773_s1] sm:$0xf]  ;;  %v122_v2 = vsel %vm120_vm0, 4294967295, %v1473_v1  ;;  %v1523_v3 = vld [vmem:[%s1774_s2 + $0x8] sm:$0xff]  ;;  %v1474_v7 = vmov 0.0  }
   0x2   :  { %v123_v4 = vsel %vm121_vm1, %v122_v2, 0  ;;  %452 = vmatpush.msra.mxu3 %v1523_v3  ;;  %v1529_v6 = vld [vmem:[%s1774_s2] sm:$0xff]  ;;  %30 = vst.msk [vmem:[#allocation3] sm:$0xff] %vm29_vm2, %v1474_v7  ;;  %v1294_v9 = vld [vmem:[%s1772_s0 + $0x28] sm:$0xff] }
   0x3   :  { %v125_v5 = vand.u32 %v123_v4, %v50_v0  ;;  %v1289_v8 = vld [vmem:[%s1772_s0] sm:$0xff]  ;;  %31 = vst.msk [vmem:[#allocation3 + $0x8] sm:$0xff] %vm29_vm2, %v1474_v7 }
   0x4   :  { %453 = vmatpush.msra.mxu3 %v1529_v6 }
   0x5   :  { %11 = vsyncpa [#allocation6], 0  ;;  %134 = vmatpush.bf16.msra.mxu0 %v125_v5  ;;  %1298 = vmatpush.bf16.msra.mxu1 %v125_v5  ;;  %vm95_vm3 = vcmask 56320   ;;  %32 = vst.msk [vmem:[#allocation4] sm:$0xff] %vm29_vm2, %v1474_v7  ;;  %s1475_s2 = smov 16   ;;  %vm176_vm4 = vcmask 523264  }
   0x6   :  { %33 = vst.msk [vmem:[#allocation4 + $0x8] sm:$0xff] %vm29_vm2, %v1474_v7  ;;  %1299 = vmatpush.bf16.msra.mxu2 %v125_v5  ;;  %785 = vmatpush.msrb.mxu3 %v1523_v3  ;;  %v1561_v14 = vld [vmem:[%s1775_s3] ss:$0 sm:$0xff]  ;;  %s1476_s3 = smov 80   ;;  %s1477_s14 = smov 96  }
   0x7   :  { %s1200_s1 = sshll.u32 %s1778_s6, 4  ;;  %s1480_s27 = smov 128   ;;  %s1201_s1 = int_to_ptr.hbm [resolvable:$true] %s1200_s1 }
   0x8   :  { %1244 = vmatmul.msk.bf16.vlgmr.msra.gmra.mxu0 %vm95_vm3, %v1289_v8  ;;  %1249 = vmatmul.msk.bf16.vlgmr.msra.gmra.mxu1 %vm95_vm3, %v1294_v9  ;;  %v1295_v9 = vld [vmem:[%s1772_s0 + $0x30] sm:$0xff]  ;;  %s1481_s28 = smov 8  }
   0x9   :  { %222 = vmatpush.msrb.mxu1 %v1523_v3  ;;  %786 = vmatpush.msrb.mxu3 %v1529_v6  ;;  %v195_v12 = vld [vmem:[#allocation3] sm:$0xff] }
   0xa   :  { %341 = vmatpush.msrb.mxu2 %v1523_v3  ;;  %v196_v13 = vld [vmem:[#allocation3 + $0x8] sm:$0xff] }
   0xb   :  { %223 = vmatpush.msrb.mxu1 %v1529_v6  ;;  %1250 = vmatmul.msk.bf16.vlgmr.msra.gmra.mxu2 %vm95_vm3, %v1295_v9 }
   0xc   :  { %342 = vmatpush.msrb.mxu2 %v1529_v6  ;;  %v197_v10 = vld [vmem:[#allocation4] sm:$0xff] }
   0xd   :  { %563 = vmatpush.msra.mxu1 %v1523_v3  ;;  %275 = vrot.lane.b32.xlu1 %v197_v10, %s1475_s2  ;;  %v198_v11 = vld [vmem:[#allocation4 + $0x8] sm:$0xff]  ;;  %v1290_v10 = vld [vmem:[%s1772_s0 + $0x8] sm:$0xff] }
   0xe   :  { %277 = vrot.lane.b32.xlu2 %v198_v11, %s1475_s2  ;;  %674 = vmatpush.msra.mxu2 %v1523_v3 }
   0xf   :  { %564 = vmatpush.msra.mxu1 %v1529_v6 }
  0x10   :  { %675 = vmatpush.msra.mxu2 %v1529_v6 }
  0x18   :  { %1252 = vmatmul.msk.f32.vlgmr.msrb.gmra.mxu1 %vm29_vm2, %v195_v12  ;;  %1245 = vmatmul.msk.bf16.gmra.mxu0 %vm95_vm3, %v1290_v10 }
  0x19   :  { %896 = vmatpush.msrb.mxu1 %v1523_v3 }
  0x1b   :  { %897 = vmatpush.msrb.mxu1 %v1529_v6 }
  0x20   :  { %1253 = vmatmul.msk.f32.gmra.mxu1 %vm29_vm2, %v196_v13  ;;  %v1296_v13 = vld [vmem:[%s1772_s0 + $0x38] sm:$0xff] }
  0x21   :  { %1251 = vmatmul.msk.bf16.gmra.mxu2 %vm95_vm3, %v1296_v13 }
  0x68   :  { %v278_v61 = vpop.permute.xlu2 %277 }
  0x7f   :  { %v276_v1 = vpop.permute.xlu1 %275 }
  0x85   :  { %v136_v15 = vpop.f32.mrf.mxu0  ;;  %v161_v16 = vpop.f32.mrf.mxu1 }
  0x86   :  { %v137_v17 = vadd.f32 %v1561_v14, %v136_v15  ;;  %v162_v18 = vadd.f32 %v1561_v14, %v161_v16 }
  0x88   :  { %177 = vst.msk [vmem:[#allocation2] sm:$0xff] %vm176_vm4, %v137_v17 }
  0x89   :  { %187 = vst.msk [vmem:[#allocation2 + $0x50] sm:$0xff] %vm176_vm4, %v162_v18 }
  0x8d   :  { %v138_v19 = vpop.f32.mrf.mxu0  ;;  %v163_v20 = vpop.f32.mrf.mxu1 }
  0x8e   :  { %v139_v21 = vadd.f32 %v1561_v14, %v138_v19  ;;  %v164_v22 = vadd.f32 %v1561_v14, %v163_v20 }
  0x8f   :  { %v199_v23 = vld [vmem:[#allocation2] sm:$0xff] }
  0x90   :  { %178 = vst.msk [vmem:[#allocation2 + $0x8] sm:$0xff] %vm176_vm4, %v139_v21  ;;  %v166_v21 = vpop.f32.mrf.mxu2 }
  0x91   :  { %188 = vst.msk [vmem:[#allocation2 + $0x58] sm:$0xff] %vm176_vm4, %v164_v22  ;;  %v167_v22 = vadd.f32 %v1561_v14, %v166_v21 }
  0x93   :  { %189 = vst.msk [vmem:[#allocation2 + $0x60] sm:$0xff] %vm176_vm4, %v167_v22 }
  0x95   :  { %v225_v24 = vpop.f32.mrf.mxu1  ;;  %v141_v18 = vpop.f32.mrf.mxu0 }
  0x96   :  { %v231_v25 = vadd.f32 %v225_v24, %v199_v23  ;;  %v142_v19 = vadd.f32 %v1561_v14, %v141_v18 }
  0x97   :  { %v200_v26 = vld [vmem:[#allocation2 + $0x8] sm:$0xff] }
  0x98   :  { %1311 = vtanh.f32 %v231_v25  ;;  %v1254_v31 = vmul.f32 -1.442695, %v231_v25  ;;  %179 = vst.msk [vmem:[#allocation2 + $0x10] sm:$0xff] %vm176_vm4, %v142_v19 }
  0x9d   :  { %v228_v27 = vpop.f32.mrf.mxu1  ;;  %v143_v23 = vpop.f32.mrf.mxu0 }
  0x9e   :  { %v1312_v28 = vpop.eup %1311  ;;  %v232_v29 = vadd.f32 %v228_v27, %v200_v26  ;;  %v144_v24 = vadd.f32 %v1561_v14, %v143_v23 }
  0x9f   :  { %285 = vrot.lane.b32.xlu0 %v1312_v28, %s1476_s3 }
  0xa0   :  { %1313 = vtanh.f32 %v232_v29  ;;  %v1255_v32 = vmul.f32 -1.442695, %v232_v29  ;;  %180 = vst.msk [vmem:[#allocation2 + $0x18] sm:$0xff] %vm176_vm4, %v144_v24  ;;  %v315_v29 = vld [vmem:[#allocation2 + $0x10] sm:$0xff] }
  0xa1   :  { %1315 = vpow2.f32 %v1254_v31 }
  0xa2   :  { %1317 = vpow2.f32 %v1255_v32 }
  0xa6   :  { %v1314_v30 = vpop.eup %1313 }
  0xa7   :  { %287 = vrot.lane.b32.xlu0 %v1314_v30, %s1476_s3  ;;  %v1316_v33 = vpop.eup %1315  ;;  %v316_v32 = vld [vmem:[#allocation2 + $0x18] sm:$0xff] }
  0xa8   :  { %v239_v34 = vadd.f32 1.0, %v1316_v33  ;;  %v1318_v35 = vpop.eup %1317 }
  0xa9   :  { %v240_v36 = vadd.f32 1.0, %v1318_v35 }
  0xaa   :  { %1319 = vrcp.f32 %v239_v34  ;;  %v252_v45 = vand.u32 2147483648, %v239_v34  ;;  %vm246_vm6 = vweird.f32 %v239_v34  ;;  %v250_v46 = vand.u32 2147483647, %v239_v34 }
  0xab   :  { %1321 = vrcp.f32 %v240_v36  ;;  %v267_v54 = vand.u32 2147483648, %v240_v36  ;;  %vm261_vm10 = vweird.f32 %v240_v36  ;;  %v265_v55 = vand.u32 2147483647, %v240_v36 }
  0xac   :  { %v253_v49 = vor.u32 1.1754944e-38, %v252_v45  ;;  %vm251_vm8 = vcmp.eq.f32.partialorder %v250_v46, 8.507059e+37 }
  0xad   :  { %v268_v57 = vor.u32 1.1754944e-38, %v267_v54  ;;  %vm266_vm12 = vcmp.eq.f32.partialorder %v265_v55, 8.507059e+37 }
  0xb0   :  { %v1320_v37 = vpop.eup %1319 }
  0xb1   :  { %v242_v38 = vmul.f32 %v1320_v37, %v239_v34  ;;  %v1322_v40 = vpop.eup %1321  ;;  %vm247_vm5 = vweird.f32 %v1320_v37 }
  0xb2   :  { %v257_v42 = vmul.f32 %v1322_v40, %v240_v36  ;;  %vm248_vm7 = vmor %vm246_vm6, %vm247_vm5  ;;  %vm262_vm9 = vweird.f32 %v1322_v40 }
  0xb3   :  { %v243_v39 = vsub.f32 1.0, %v242_v38  ;;  %vm263_vm11 = vmor %vm261_vm10, %vm262_vm9 }
  0xb4   :  { %v258_v44 = vsub.f32 1.0, %v257_v42 }
  0xb5   :  { %v244_v41 = vmul.f32 %v1320_v37, %v243_v39 }
  0xb6   :  { %v259_v48 = vmul.f32 %v1322_v40, %v258_v44 }
  0xb7   :  { %v245_v43 = vadd.f32 %v1320_v37, %v244_v41 }
  0xb8   :  { %v260_v52 = vadd.f32 %v1322_v40, %v259_v48 }
  0xb9   :  { %v249_v47 = vsel %vm248_vm7, %v1320_v37, %v245_v43 }
  0xba   :  { %v254_v50 = vsel %vm251_vm8, %v253_v49, %v249_v47  ;;  %v264_v56 = vsel %vm263_vm11, %v1322_v40, %v260_v52 }
  0xbb   :  { %v269_v58 = vsel %vm266_vm12, %v268_v57, %v264_v56  ;;  %v281_v4 = vmul.f32 %v276_v1, %v254_v50 }
  0xbc   :  { %v282_v62 = vmul.f32 %v278_v61, %v269_v58 }
 0x111   :  { %v286_v51 = vpop.permute.xlu0 %285 }
 0x112   :  { %v291_v53 = vmul.f32 %v286_v51, %v254_v50 }
 0x114   :  { %295 = vrot.lane.b32.xlu1 %v291_v53, %s1475_s2 }
 0x119   :  { %v288_v59 = vpop.permute.xlu0 %287 }
 0x11a   :  { %v292_v60 = vmul.f32 %v288_v59, %v269_v58 }
 0x11c   :  { %297 = vrot.lane.b32.xlu2 %v292_v60, %s1475_s2 }
 0x176   :  { %v298_v63 = vpop.permute.xlu2 %297 }
 0x177   :  { %v1575_v0 = vadd.f32 %v298_v63, %v282_v62 }
 0x179   :  { %1323 = vtanh.f32 %v1575_v0 }
 0x17f   :  { %v1324_v2 = vpop.eup %1323 }
 0x180   :  { %309 = vrot.lane.b32.xlu1 %v1324_v2, %s1475_s2 }
 0x186   :  { %v296_v5 = vpop.permute.xlu1 %295 }
 0x187   :  { %v1579_v7 = vadd.f32 %v296_v5, %v281_v4 }
 0x189   :  { %1325 = vtanh.f32 %v1579_v7 }
 0x18f   :  { %v1326_v8 = vpop.eup %1325 }
 0x190   :  { %307 = vrot.lane.b32.xlu0 %v1326_v8, %s1475_s2 }
 0x1f2   :  { %v310_v11 = vpop.permute.xlu1 %309 }
 0x1f3   :  { %v314_v12 = vmul.f32 %v310_v11, %v269_v58 }
 0x1f5   :  { %321 = vrot.lane.b32.xlu0 %v314_v12, %s1477_s14 }
 0x202   :  { %v308_v15 = vpop.permute.xlu0 %307 }
 0x203   :  { %v313_v16 = vmul.f32 %v308_v15, %v254_v50 }
 0x205   :  { %319 = vrot.lane.b32.xlu2 %v313_v16, %s1477_s14 }
 0x25f   :  { %v320_v17 = vpop.permute.xlu2 %319 }
 0x260   :  { %1256 = vmatmul.msk.f32.vlgmr.msrb.gmra.mxu2 %vm29_vm2, %v320_v17 }
 0x261   :  { %1007 = vmatpush.msrb.mxu2 %v1523_v3  ;;  %v168_v3 = vpop.f32.mrf.mxu2 }
 0x263   :  { %1008 = vmatpush.msrb.mxu2 %v1529_v6  ;;  %v169_v6 = vadd.f32 %v1561_v14, %v168_v3 }
 0x265   :  { %190 = vst.msk [vmem:[#allocation2 + $0x68] sm:$0xff] %vm176_vm4, %v169_v6 }
 0x267   :  { %v322_v20 = vpop.permute.xlu0 %321 }
 0x268   :  { %1257 = vmatmul.msk.f32.gmra.mxu2 %vm29_vm2, %v322_v20 }
 0x269   :  { %v171_v25 = vpop.f32.mrf.mxu2 }
 0x26a   :  { %v172_v26 = vadd.f32 %v1561_v14, %v171_v25 }
 0x26c   :  { %191 = vst.msk [vmem:[#allocation2 + $0x70] sm:$0xff] %vm176_vm4, %v172_v26 }
 0x271   :  { %v173_v27 = vpop.f32.mrf.mxu2 }
 0x272   :  { %v174_v28 = vadd.f32 %v1561_v14, %v173_v27 }
 0x274   :  { %192 = vst.msk [vmem:[#allocation2 + $0x78] sm:$0xff] %vm176_vm4, %v174_v28 }
 0x2e3   :  { %v344_v30 = vpop.f32.mrf.mxu2 }
 0x2e4   :  { %v350_v31 = vadd.f32 %v344_v30, %v315_v29 }
 0x2e6   :  { %1327 = vtanh.f32 %v350_v31  ;;  %v1258_v40 = vmul.f32 -1.442695, %v350_v31 }
 0x2eb   :  { %v347_v33 = vpop.f32.mrf.mxu2 }
 0x2ec   :  { %v1328_v34 = vpop.eup %1327  ;;  %v351_v35 = vadd.f32 %v347_v33, %v316_v32 }
 0x2ed   :  { %396 = vrot.lane.b32.xlu1 %v1328_v34, %s1476_s3 }
 0x2ee   :  { %1329 = vtanh.f32 %v351_v35  ;;  %v1259_v37 = vmul.f32 -1.442695, %v351_v35 }
 0x2f0   :  { %1331 = vpow2.f32 %v1259_v37 }
 0x2f4   :  { %v1330_v36 = vpop.eup %1329 }
 0x2f5   :  { %398 = vrot.lane.b32.xlu2 %v1330_v36, %s1476_s3 }
 0x2f6   :  { %v1332_v38 = vpop.eup %1331 }
 0x2f7   :  { %v359_v39 = vadd.f32 1.0, %v1332_v38 }
 0x2f9   :  { %1333 = vrcp.f32 %v359_v39  ;;  %v386_v49 = vand.u32 2147483648, %v359_v39  ;;  %vm380_vm14 = vweird.f32 %v359_v39  ;;  %v384_v50 = vand.u32 2147483647, %v359_v39 }
 0x2fa   :  { %1335 = vpow2.f32 %v1258_v40 }
 0x2fb   :  { %v387_v53 = vor.u32 1.1754944e-38, %v386_v49  ;;  %vm385_vm0 = vcmp.eq.f32.partialorder %v384_v50, 8.507059e+37 }
 0x2ff   :  { %v1334_v41 = vpop.eup %1333 }
 0x300   :  { %v1336_v42 = vpop.eup %1335  ;;  %v376_v43 = vmul.f32 %v1334_v41, %v359_v39  ;;  %vm381_vm13 = vweird.f32 %v1334_v41 }
 0x301   :  { %v358_v44 = vadd.f32 1.0, %v1336_v42  ;;  %vm382_vm15 = vmor %vm380_vm14, %vm381_vm13 }
 0x302   :  { %v377_v45 = vsub.f32 1.0, %v376_v43 }
 0x303   :  { %1337 = vrcp.f32 %v358_v44  ;;  %v371_v60 = vand.u32 2147483648, %v358_v44  ;;  %vm365_vm5 = vweird.f32 %v358_v44  ;;  %v369_v61 = vand.u32 2147483647, %v358_v44 }
 0x304   :  { %v378_v46 = vmul.f32 %v1334_v41, %v377_v45 }
 0x305   :  { %v372_v63 = vor.u32 1.1754944e-38, %v371_v60  ;;  %vm370_vm7 = vcmp.eq.f32.partialorder %v369_v61, 8.507059e+37 }
 0x306   :  { %v379_v47 = vadd.f32 %v1334_v41, %v378_v46 }
 0x308   :  { %v383_v51 = vsel %vm382_vm15, %v1334_v41, %v379_v47 }
 0x309   :  { %v1338_v48 = vpop.eup %1337  ;;  %v388_v55 = vsel %vm385_vm0, %v387_v53, %v383_v51 }
 0x30a   :  { %v361_v52 = vmul.f32 %v1338_v48, %v358_v44  ;;  %vm366_vm1 = vweird.f32 %v1338_v48  ;;  %v393_v5 = vmul.f32 %v388_v55, %v1575_v0 }
 0x30b   :  { %vm367_vm6 = vmor %vm365_vm5, %vm366_vm1 }
 0x30c   :  { %v362_v57 = vsub.f32 1.0, %v361_v52 }
 0x30e   :  { %v363_v58 = vmul.f32 %v1338_v48, %v362_v57 }
 0x310   :  { %v364_v59 = vadd.f32 %v1338_v48, %v363_v58 }
 0x312   :  { %v368_v62 = vsel %vm367_vm6, %v1338_v48, %v364_v59 }
 0x313   :  { %v373_v1 = vsel %vm370_vm7, %v372_v63, %v368_v62 }
 0x314   :  { %v392_v11 = vmul.f32 %v373_v1, %v1579_v7  ;;  %v1291_v7 = vld [vmem:[%s1772_s0 + $0x10] sm:$0xff] }
 0x315   :  { %1246 = vmatmul.msk.bf16.gmra.mxu0 %vm95_vm3, %v1291_v7 }
 0x34f   :  { %v399_v54 = vpop.permute.xlu2 %398 }
 0x350   :  { %v403_v56 = vmul.f32 %v399_v54, %v388_v55 }
 0x352   :  { %408 = vrot.lane.b32.xlu1 %v403_v56, %s1475_s2 }
 0x35f   :  { %v397_v2 = vpop.permute.xlu1 %396 }
 0x360   :  { %v402_v4 = vmul.f32 %v397_v2, %v373_v1 }
 0x362   :  { %406 = vrot.lane.b32.xlu0 %v402_v4, %s1475_s2 }
 0x392   :  { %v146_v21 = vpop.f32.mrf.mxu0 }
 0x393   :  { %v147_v22 = vadd.f32 %v1561_v14, %v146_v21 }
 0x395   :  { %181 = vst.msk [vmem:[#allocation2 + $0x20] sm:$0xff] %vm176_vm4, %v147_v22 }
 0x39a   :  { %v148_v23 = vpop.f32.mrf.mxu0 }
 0x39b   :  { %v149_v24 = vadd.f32 %v1561_v14, %v148_v23 }
 0x39c   :  { %v426_v3 = vld [vmem:[#allocation2 + $0x20] sm:$0xff] }
 0x39d   :  { %182 = vst.msk [vmem:[#allocation2 + $0x28] sm:$0xff] %vm176_vm4, %v149_v24 }
 0x3a4   :  { %v427_v26 = vld [vmem:[#allocation2 + $0x28] sm:$0xff] }
 0x3c4   :  { %v409_v8 = vpop.permute.xlu1 %408 }
 0x3c5   :  { %v1620_v9 = vadd.f32 %v409_v8, %v393_v5 }
 0x3c7   :  { %1339 = vtanh.f32 %v1620_v9 }
 0x3cd   :  { %v1340_v10 = vpop.eup %1339 }
 0x3ce   :  { %420 = vrot.lane.b32.xlu0 %v1340_v10, %s1475_s2  ;;  %v1292_v10 = vld [vmem:[%s1772_s0 + $0x18] sm:$0xff] }
 0x3cf   :  { %1247 = vmatmul.msk.bf16.gmra.mxu0 %vm95_vm3, %v1292_v10 }
 0x3d4   :  { %v407_v12 = vpop.permute.xlu0 %406 }
 0x3d5   :  { %v1625_v13 = vadd.f32 %v407_v12, %v392_v11 }
 0x3d7   :  { %1341 = vtanh.f32 %v1625_v13 }
 0x3dd   :  { %v1342_v15 = vpop.eup %1341 }
 0x3de   :  { %418 = vrot.lane.b32.xlu2 %v1342_v15, %s1475_s2 }
 0x438   :  { %v419_v16 = vpop.permute.xlu2 %418 }
 0x439   :  { %v424_v0 = vmul.f32 %v419_v16, %v373_v1 }
 0x43b   :  { %430 = vrot.lane.b32.xlu1 %v424_v0, %s1477_s14 }
 0x440   :  { %v421_v17 = vpop.permute.xlu0 %420 }
 0x441   :  { %v425_v18 = vmul.f32 %v421_v17, %v388_v55 }
 0x443   :  { %432 = vrot.lane.b32.xlu2 %v425_v18, %s1477_s14 }
 0x44c   :  { %v151_v15 = vpop.f32.mrf.mxu0 }
 0x44d   :  { %v152_v16 = vadd.f32 %v1561_v14, %v151_v15 }
 0x44f   :  { %183 = vst.msk [vmem:[#allocation2 + $0x30] sm:$0xff] %vm176_vm4, %v152_v16 }
 0x454   :  { %v153_v0 = vpop.f32.mrf.mxu0 }
 0x455   :  { %v154_v17 = vadd.f32 %v1561_v14, %v153_v0 }
 0x457   :  { %184 = vst.msk [vmem:[#allocation2 + $0x38] sm:$0xff] %vm176_vm4, %v154_v17 }
 0x45e   :  { %v538_v22 = vld [vmem:[#allocation2 + $0x38] sm:$0xff] }
 0x49d   :  { %v433_v20 = vpop.permute.xlu2 %432 }
 0x4ad   :  { %v431_v19 = vpop.permute.xlu1 %430 }
 0x4ae   :  { %1260 = vmatmul.msk.f32.vlgmr.msra.gmra.mxu3 %vm29_vm2, %v431_v19  ;;  %v537_v19 = vld [vmem:[#allocation2 + $0x30] sm:$0xff] }
 0x4b6   :  { %1261 = vmatmul.msk.f32.gmra.mxu3 %vm29_vm2, %v433_v20 }
 0x531   :  { %v455_v6 = vpop.f32.mrf.mxu3 }
 0x532   :  { %v461_v25 = vadd.f32 %v455_v6, %v426_v3 }
 0x534   :  { %1343 = vtanh.f32 %v461_v25  ;;  %v1262_v31 = vmul.f32 -1.442695, %v461_v25 }
 0x539   :  { %v458_v27 = vpop.f32.mrf.mxu3 }
 0x53a   :  { %v1344_v28 = vpop.eup %1343  ;;  %v462_v29 = vadd.f32 %v458_v27, %v427_v26 }
 0x53b   :  { %507 = vrot.lane.b32.xlu0 %v1344_v28, %s1476_s3 }
 0x53c   :  { %1345 = vtanh.f32 %v462_v29  ;;  %v1263_v32 = vmul.f32 -1.442695, %v462_v29 }
 0x53d   :  { %1347 = vpow2.f32 %v1262_v31 }
 0x53e   :  { %1349 = vpow2.f32 %v1263_v32 }
 0x542   :  { %v1346_v30 = vpop.eup %1345 }
 0x543   :  { %509 = vrot.lane.b32.xlu1 %v1346_v30, %s1476_s3  ;;  %v1348_v33 = vpop.eup %1347 }
 0x544   :  { %v469_v34 = vadd.f32 1.0, %v1348_v33  ;;  %v1350_v35 = vpop.eup %1349 }
 0x545   :  { %v470_v36 = vadd.f32 1.0, %v1350_v35 }
 0x546   :  { %1351 = vrcp.f32 %v469_v34  ;;  %v482_v45 = vand.u32 2147483648, %v469_v34  ;;  %vm476_vm9 = vweird.f32 %v469_v34  ;;  %v480_v46 = vand.u32 2147483647, %v469_v34 }
 0x547   :  { %1353 = vrcp.f32 %v470_v36  ;;  %v497_v54 = vand.u32 2147483648, %v470_v36  ;;  %vm491_vm13 = vweird.f32 %v470_v36  ;;  %v495_v55 = vand.u32 2147483647, %v470_v36 }
 0x548   :  { %v483_v49 = vor.u32 1.1754944e-38, %v482_v45  ;;  %vm481_vm11 = vcmp.eq.f32.partialorder %v480_v46, 8.507059e+37 }
 0x549   :  { %v498_v57 = vor.u32 1.1754944e-38, %v497_v54  ;;  %vm496_vm15 = vcmp.eq.f32.partialorder %v495_v55, 8.507059e+37 }
 0x54c   :  { %v1352_v37 = vpop.eup %1351 }
 0x54d   :  { %v472_v38 = vmul.f32 %v1352_v37, %v469_v34  ;;  %v1354_v40 = vpop.eup %1353  ;;  %vm477_vm8 = vweird.f32 %v1352_v37 }
 0x54e   :  { %v487_v42 = vmul.f32 %v1354_v40, %v470_v36  ;;  %vm478_vm10 = vmor %vm476_vm9, %vm477_vm8  ;;  %vm492_vm12 = vweird.f32 %v1354_v40 }
 0x54f   :  { %v473_v39 = vsub.f32 1.0, %v472_v38  ;;  %vm493_vm14 = vmor %vm491_vm13, %vm492_vm12 }
 0x550   :  { %v488_v44 = vsub.f32 1.0, %v487_v42 }
 0x551   :  { %v474_v41 = vmul.f32 %v1352_v37, %v473_v39 }
 0x552   :  { %v489_v48 = vmul.f32 %v1354_v40, %v488_v44 }
 0x553   :  { %v475_v43 = vadd.f32 %v1352_v37, %v474_v41 }
 0x554   :  { %v490_v53 = vadd.f32 %v1354_v40, %v489_v48 }
 0x555   :  { %v479_v47 = vsel %vm478_vm10, %v1352_v37, %v475_v43 }
 0x556   :  { %v484_v51 = vsel %vm481_vm11, %v483_v49, %v479_v47  ;;  %v494_v56 = vsel %vm493_vm14, %v1354_v40, %v490_v53 }
 0x557   :  { %v499_v59 = vsel %vm496_vm15, %v498_v57, %v494_v56  ;;  %v503_v61 = vmul.f32 %v484_v51, %v1625_v13 }
 0x558   :  { %v504_v2 = vmul.f32 %v499_v59, %v1620_v9 }
 0x5ad   :  { %v508_v50 = vpop.permute.xlu0 %507 }
 0x5ae   :  { %v513_v52 = vmul.f32 %v508_v50, %v484_v51 }
 0x5b0   :  { %517 = vrot.lane.b32.xlu2 %v513_v52, %s1475_s2 }
 0x5b5   :  { %v510_v58 = vpop.permute.xlu1 %509 }
 0x5b6   :  { %v514_v60 = vmul.f32 %v510_v58, %v499_v59 }
 0x5b8   :  { %519 = vrot.lane.b32.xlu0 %v514_v60, %s1475_s2 }
 0x60a   :  { %v518_v62 = vpop.permute.xlu2 %517 }
 0x60b   :  { %v1646_v63 = vadd.f32 %v518_v62, %v503_v61 }
 0x60d   :  { %1355 = vtanh.f32 %v1646_v63 }
 0x613   :  { %v1356_v1 = vpop.eup %1355 }
 0x614   :  { %529 = vrot.lane.b32.xlu1 %v1356_v1, %s1475_s2 }
 0x62a   :  { %v520_v4 = vpop.permute.xlu0 %519 }
 0x62b   :  { %v1651_v5 = vadd.f32 %v520_v4, %v504_v2 }
 0x62d   :  { %1357 = vtanh.f32 %v1651_v5 }
 0x633   :  { %v1358_v8 = vpop.eup %1357 }
 0x634   :  { %531 = vrot.lane.b32.xlu2 %v1358_v8, %s1475_s2 }
 0x686   :  { %v530_v11 = vpop.permute.xlu1 %529 }
 0x687   :  { %v535_v12 = vmul.f32 %v530_v11, %v484_v51 }
 0x689   :  { %541 = vrot.lane.b32.xlu0 %v535_v12, %s1477_s14 }
 0x68e   :  { %v532_v13 = vpop.permute.xlu2 %531 }
 0x68f   :  { %v536_v9 = vmul.f32 %v532_v13, %v499_v59 }
 0x691   :  { %543 = vrot.lane.b32.xlu1 %v536_v9, %s1477_s14 }
 0x6fb   :  { %v542_v18 = vpop.permute.xlu0 %541 }
 0x6fc   :  { %1264 = vmatmul.msk.f32.vlgmr.msra.gmra.mxu1 %vm29_vm2, %v542_v18 }
 0x703   :  { %v544_v7 = vpop.permute.xlu1 %543 }
 0x704   :  { %1265 = vmatmul.msk.f32.gmra.mxu1 %vm29_vm2, %v544_v7 }
 0x779   :  { %v566_v20 = vpop.f32.mrf.mxu1 }
 0x77a   :  { %v572_v21 = vadd.f32 %v566_v20, %v537_v19 }
 0x77c   :  { %1359 = vtanh.f32 %v572_v21  ;;  %v1266_v25 = vmul.f32 -1.442695, %v572_v21 }
 0x781   :  { %v569_v23 = vpop.f32.mrf.mxu1 }
 0x782   :  { %v1360_v24 = vpop.eup %1359  ;;  %v573_v3 = vadd.f32 %v569_v23, %v538_v22 }
 0x783   :  { %618 = vrot.lane.b32.xlu2 %v1360_v24, %s1476_s3 }
 0x784   :  { %1361 = vtanh.f32 %v573_v3  ;;  %v1267_v31 = vmul.f32 -1.442695, %v573_v3 }
 0x785   :  { %1363 = vpow2.f32 %v1266_v25 }
 0x78a   :  { %v1362_v6 = vpop.eup %1361 }
 0x78b   :  { %620 = vrot.lane.b32.xlu0 %v1362_v6, %s1476_s3  ;;  %v1364_v26 = vpop.eup %1363 }
 0x78c   :  { %v580_v27 = vadd.f32 1.0, %v1364_v26 }
 0x78e   :  { %1365 = vrcp.f32 %v580_v27  ;;  %v593_v34 = vand.u32 2147483648, %v580_v27  ;;  %vm587_vm1 = vweird.f32 %v580_v27  ;;  %v591_v35 = vand.u32 2147483647, %v580_v27 }
 0x78f   :  { %1367 = vpow2.f32 %v1267_v31 }
 0x790   :  { %v594_v38 = vor.u32 1.1754944e-38, %v593_v34  ;;  %vm592_vm6 = vcmp.eq.f32.partialorder %v591_v35, 8.507059e+37 }
 0x794   :  { %v1366_v28 = vpop.eup %1365 }
 0x795   :  { %v583_v29 = vmul.f32 %v1366_v28, %v580_v27  ;;  %vm588_vm0 = vweird.f32 %v1366_v28  ;;  %v1368_v36 = vpop.eup %1367 }
 0x796   :  { %vm589_vm5 = vmor %vm587_vm1, %vm588_vm0  ;;  %v581_v39 = vadd.f32 1.0, %v1368_v36 }
 0x797   :  { %v584_v30 = vsub.f32 1.0, %v583_v29 }
 0x798   :  { %1369 = vrcp.f32 %v581_v39  ;;  %v608_v48 = vand.u32 2147483648, %v581_v39  ;;  %vm602_vm8 = vweird.f32 %v581_v39  ;;  %v606_v49 = vand.u32 2147483647, %v581_v39 }
 0x799   :  { %v585_v32 = vmul.f32 %v1366_v28, %v584_v30 }
 0x79a   :  { %v609_v51 = vor.u32 1.1754944e-38, %v608_v48  ;;  %vm607_vm10 = vcmp.eq.f32.partialorder %v606_v49, 8.507059e+37 }
 0x79b   :  { %v586_v33 = vadd.f32 %v1366_v28, %v585_v32 }
 0x79d   :  { %v590_v37 = vsel %vm589_vm5, %v1366_v28, %v586_v33 }
 0x79e   :  { %v595_v40 = vsel %vm592_vm6, %v594_v38, %v590_v37  ;;  %v1370_v43 = vpop.eup %1369 }
 0x79f   :  { %v598_v44 = vmul.f32 %v1370_v43, %v581_v39  ;;  %vm603_vm7 = vweird.f32 %v1370_v43  ;;  %v614_v55 = vmul.f32 %v595_v40, %v1646_v63  ;;  %v1293_v63 = vld [vmem:[%s1772_s0 + $0x20] sm:$0xff] }
 0x7a0   :  { %vm604_vm9 = vmor %vm602_vm8, %vm603_vm7  ;;  %1248 = vmatmul.msk.bf16.gmra.mxu0 %vm95_vm3, %v1293_v63 }
 0x7a1   :  { %v599_v45 = vsub.f32 1.0, %v598_v44 }
 0x7a3   :  { %v600_v46 = vmul.f32 %v1370_v43, %v599_v45 }
 0x7a5   :  { %v601_v47 = vadd.f32 %v1370_v43, %v600_v46 }
 0x7a7   :  { %v605_v50 = vsel %vm604_vm9, %v1370_v43, %v601_v47 }
 0x7a8   :  { %v610_v53 = vsel %vm607_vm10, %v609_v51, %v605_v50 }
 0x7a9   :  { %v615_v58 = vmul.f32 %v610_v53, %v1651_v5 }
 0x7dd   :  { %v619_v41 = vpop.permute.xlu2 %618 }
 0x7de   :  { %v624_v42 = vmul.f32 %v619_v41, %v595_v40 }
 0x7e0   :  { %628 = vrot.lane.b32.xlu1 %v624_v42, %s1475_s2 }
 0x7fd   :  { %v621_v52 = vpop.permute.xlu0 %620 }
 0x7fe   :  { %v625_v54 = vmul.f32 %v621_v52, %v610_v53 }
 0x800   :  { %630 = vrot.lane.b32.xlu2 %v625_v54, %s1475_s2 }
 0x81d   :  { %v156_v10 = vpop.f32.mrf.mxu0 }
 0x81e   :  { %v157_v11 = vadd.f32 %v1561_v14, %v156_v10 }
 0x820   :  { %185 = vst.msk [vmem:[#allocation2 + $0x40] sm:$0xff] %vm176_vm4, %v157_v11 }
 0x825   :  { %v158_v12 = vpop.f32.mrf.mxu0 }
 0x826   :  { %v159_v13 = vadd.f32 %v1561_v14, %v158_v12 }
 0x827   :  { %v648_v15 = vld [vmem:[#allocation2 + $0x40] sm:$0xff] }
 0x828   :  { %186 = vst.msk [vmem:[#allocation2 + $0x48] sm:$0xff] %vm176_vm4, %v159_v13 }
 0x82f   :  { %v649_v18 = vld [vmem:[#allocation2 + $0x48] sm:$0xff] }
 0x852   :  { %v629_v56 = vpop.permute.xlu1 %628 }
 0x853   :  { %v1672_v57 = vadd.f32 %v629_v56, %v614_v55 }
 0x855   :  { %1371 = vtanh.f32 %v1672_v57 }
 0x85a   :  { %v631_v59 = vpop.permute.xlu2 %630 }
 0x85b   :  { %v1372_v60 = vpop.eup %1371  ;;  %v1676_v61 = vadd.f32 %v631_v59, %v615_v58 }
 0x85c   :  { %640 = vrot.lane.b32.xlu0 %v1372_v60, %s1475_s2 }
 0x85d   :  { %1373 = vtanh.f32 %v1676_v61 }
 0x863   :  { %v1374_v62 = vpop.eup %1373 }
 0x864   :  { %642 = vrot.lane.b32.xlu1 %v1374_v62, %s1475_s2  ;;  %v759_v62 = vld [vmem:[#allocation2 + $0x50] sm:$0xff] }
 0x8ce   :  { %v641_v1 = vpop.permute.xlu0 %640 }
 0x8cf   :  { %v646_v2 = vmul.f32 %v641_v1, %v595_v40 }
 0x8d1   :  { %652 = vrot.lane.b32.xlu2 %v646_v2, %s1477_s14  ;;  %v760_v2 = vld [vmem:[#allocation2 + $0x58] sm:$0xff] }
 0x8d6   :  { %v643_v4 = vpop.permute.xlu1 %642 }
 0x8d7   :  { %v647_v5 = vmul.f32 %v643_v4, %v610_v53 }
 0x8d9   :  { %654 = vrot.lane.b32.xlu0 %v647_v5, %s1477_s14 }
 0x92b   :  { %v653_v8 = vpop.permute.xlu2 %652 }
 0x92c   :  { %1268 = vmatmul.msk.f32.vlgmr.msra.gmra.mxu2 %vm29_vm2, %v653_v8 }
 0x94b   :  { %v655_v9 = vpop.permute.xlu0 %654 }
 0x94c   :  { %1269 = vmatmul.msk.f32.gmra.mxu2 %vm29_vm2, %v655_v9 }
 0x9af   :  { %v677_v16 = vpop.f32.mrf.mxu2 }
 0x9b0   :  { %v683_v0 = vadd.f32 %v677_v16, %v648_v15 }
 0x9b2   :  { %1375 = vtanh.f32 %v683_v0  ;;  %v1270_v14 = vmul.f32 -1.442695, %v683_v0 }
 0x9b8   :  { %v1376_v17 = vpop.eup %1375 }
 0x9b9   :  { %729 = vrot.lane.b32.xlu1 %v1376_v17, %s1476_s3 }
 0x9cf   :  { %v680_v7 = vpop.f32.mrf.mxu2 }
 0x9d0   :  { %v684_v19 = vadd.f32 %v680_v7, %v649_v18 }
 0x9d2   :  { %1377 = vtanh.f32 %v684_v19  ;;  %v1271_v21 = vmul.f32 -1.442695, %v684_v19 }
 0x9d3   :  { %1379 = vpow2.f32 %v1270_v14 }
 0x9d4   :  { %1381 = vpow2.f32 %v1271_v21 }
 0x9d8   :  { %v1378_v20 = vpop.eup %1377 }
 0x9d9   :  { %731 = vrot.lane.b32.xlu2 %v1378_v20, %s1476_s3  ;;  %v1380_v22 = vpop.eup %1379 }
 0x9da   :  { %v691_v23 = vadd.f32 1.0, %v1380_v22  ;;  %v1382_v24 = vpop.eup %1381 }
 0x9db   :  { %v692_v3 = vadd.f32 1.0, %v1382_v24 }
 0x9dc   :  { %1383 = vrcp.f32 %v691_v23  ;;  %v704_v32 = vand.u32 2147483648, %v691_v23  ;;  %vm698_vm4 = vweird.f32 %v691_v23  ;;  %v702_v33 = vand.u32 2147483647, %v691_v23 }
 0x9dd   :  { %1385 = vrcp.f32 %v692_v3  ;;  %v719_v41 = vand.u32 2147483648, %v692_v3  ;;  %vm713_vm14 = vweird.f32 %v692_v3  ;;  %v717_v42 = vand.u32 2147483647, %v692_v3 }
 0x9de   :  { %v705_v36 = vor.u32 1.1754944e-38, %v704_v32  ;;  %vm703_vm12 = vcmp.eq.f32.partialorder %v702_v33, 8.507059e+37 }
 0x9df   :  { %v720_v44 = vor.u32 1.1754944e-38, %v719_v41  ;;  %vm718_vm0 = vcmp.eq.f32.partialorder %v717_v42, 8.507059e+37 }
 0x9e2   :  { %v1384_v6 = vpop.eup %1383 }
 0x9e3   :  { %v694_v25 = vmul.f32 %v1384_v6, %v691_v23  ;;  %v1386_v27 = vpop.eup %1385  ;;  %vm699_vm3 = vweird.f32 %v1384_v6 }
 0x9e4   :  { %v709_v29 = vmul.f32 %v1386_v27, %v692_v3  ;;  %vm700_vm11 = vmor %vm698_vm4, %vm699_vm3  ;;  %vm714_vm13 = vweird.f32 %v1386_v27 }
 0x9e5   :  { %v695_v26 = vsub.f32 1.0, %v694_v25  ;;  %vm715_vm15 = vmor %vm713_vm14, %vm714_vm13 }
 0x9e6   :  { %v710_v31 = vsub.f32 1.0, %v709_v29 }
 0x9e7   :  { %v696_v28 = vmul.f32 %v1384_v6, %v695_v26 }
 0x9e8   :  { %v711_v35 = vmul.f32 %v1386_v27, %v710_v31 }
 0x9e9   :  { %v697_v30 = vadd.f32 %v1384_v6, %v696_v28 }
 0x9ea   :  { %v712_v40 = vadd.f32 %v1386_v27, %v711_v35 }
 0x9eb   :  { %v701_v34 = vsel %vm700_vm11, %v1384_v6, %v697_v30 }
 0x9ec   :  { %v706_v38 = vsel %vm703_vm12, %v705_v36, %v701_v34  ;;  %v716_v43 = vsel %vm715_vm15, %v1386_v27, %v712_v40 }
 0x9ed   :  { %v721_v46 = vsel %vm718_vm0, %v720_v44, %v716_v43  ;;  %v725_v48 = vmul.f32 %v706_v38, %v1672_v57 }
 0x9ee   :  { %v726_v51 = vmul.f32 %v721_v46, %v1676_v61 }
 0xa2b   :  { %v730_v37 = vpop.permute.xlu1 %729 }
 0xa2c   :  { %v735_v39 = vmul.f32 %v730_v37, %v706_v38 }
 0xa2e   :  { %739 = vrot.lane.b32.xlu0 %v735_v39, %s1475_s2 }
 0xa33   :  { %v732_v45 = vpop.permute.xlu2 %731 }
 0xa34   :  { %v736_v47 = vmul.f32 %v732_v45, %v721_v46 }
 0xa36   :  { %741 = vrot.lane.b32.xlu1 %v736_v47, %s1475_s2 }
 0xaa0   :  { %v740_v49 = vpop.permute.xlu0 %739 }
 0xaa1   :  { %v1698_v50 = vadd.f32 %v740_v49, %v725_v48 }
 0xaa3   :  { %1387 = vtanh.f32 %v1698_v50 }
 0xaa8   :  { %v742_v52 = vpop.permute.xlu1 %741 }
 0xaa9   :  { %v1388_v53 = vpop.eup %1387  ;;  %v1702_v54 = vadd.f32 %v742_v52, %v726_v51 }
 0xaaa   :  { %751 = vrot.lane.b32.xlu2 %v1388_v53, %s1475_s2  ;;  %v871_v53 = vld [vmem:[#allocation2 + $0x68] sm:$0xff] }
 0xaab   :  { %1389 = vtanh.f32 %v1702_v54 }
 0xab1   :  { %v1390_v55 = vpop.eup %1389 }
 0xab2   :  { %753 = vrot.lane.b32.xlu0 %v1390_v55, %s1475_s2 }
 0xb04   :  { %v752_v56 = vpop.permute.xlu2 %751 }
 0xb05   :  { %v757_v57 = vmul.f32 %v752_v56, %v706_v38 }
 0xb07   :  { %763 = vrot.lane.b32.xlu1 %v757_v57, %s1477_s14 }
 0xb24   :  { %v754_v58 = vpop.permute.xlu0 %753 }
 0xb25   :  { %v758_v59 = vmul.f32 %v754_v58, %v721_v46 }
 0xb27   :  { %765 = vrot.lane.b32.xlu2 %v758_v59, %s1477_s14 }
 0xb79   :  { %v764_v60 = vpop.permute.xlu1 %763 }
 0xb7a   :  { %1272 = vmatmul.msk.f32.vlgmr.msrb.gmra.mxu3 %vm29_vm2, %v764_v60 }
 0xb81   :  { %v766_v61 = vpop.permute.xlu2 %765 }
 0xb82   :  { %1273 = vmatmul.msk.f32.gmra.mxu3 %vm29_vm2, %v766_v61 }
 0xbfd   :  { %v788_v63 = vpop.f32.mrf.mxu3 }
 0xbfe   :  { %v794_v1 = vadd.f32 %v788_v63, %v759_v62 }
 0xc00   :  { %1391 = vtanh.f32 %v794_v1  ;;  %v1274_v11 = vmul.f32 -1.442695, %v794_v1 }
 0xc05   :  { %v791_v4 = vpop.f32.mrf.mxu3 }
 0xc06   :  { %v1392_v5 = vpop.eup %1391  ;;  %v795_v8 = vadd.f32 %v791_v4, %v760_v2 }
 0xc07   :  { %840 = vrot.lane.b32.xlu0 %v1392_v5, %s1476_s3 }
 0xc08   :  { %1393 = vtanh.f32 %v795_v8  ;;  %v1275_v12 = vmul.f32 -1.442695, %v795_v8 }
 0xc09   :  { %1395 = vpow2.f32 %v1274_v11 }
 0xc0a   :  { %1397 = vpow2.f32 %v1275_v12 }
 0xc0e   :  { %v1394_v10 = vpop.eup %1393 }
 0xc0f   :  { %842 = vrot.lane.b32.xlu1 %v1394_v10, %s1476_s3  ;;  %v1396_v13 = vpop.eup %1395 }
 0xc10   :  { %v802_v9 = vadd.f32 1.0, %v1396_v13  ;;  %v1398_v15 = vpop.eup %1397 }
 0xc11   :  { %v803_v16 = vadd.f32 1.0, %v1398_v15 }
 0xc12   :  { %1399 = vrcp.f32 %v802_v9  ;;  %v815_v22 = vand.u32 2147483648, %v802_v9  ;;  %vm809_vm5 = vweird.f32 %v802_v9  ;;  %v813_v23 = vand.u32 2147483647, %v802_v9 }
 0xc13   :  { %1401 = vrcp.f32 %v803_v16  ;;  %v830_v29 = vand.u32 2147483648, %v803_v16  ;;  %vm824_vm9 = vweird.f32 %v803_v16  ;;  %v828_v30 = vand.u32 2147483647, %v803_v16 }
 0xc14   :  { %v816_v6 = vor.u32 1.1754944e-38, %v815_v22  ;;  %vm814_vm7 = vcmp.eq.f32.partialorder %v813_v23, 8.507059e+37 }
 0xc15   :  { %v831_v32 = vor.u32 1.1754944e-38, %v830_v29  ;;  %vm829_vm3 = vcmp.eq.f32.partialorder %v828_v30, 8.507059e+37 }
 0xc18   :  { %v1400_v0 = vpop.eup %1399 }
 0xc19   :  { %v805_v17 = vmul.f32 %v1400_v0, %v802_v9  ;;  %v1402_v7 = vpop.eup %1401  ;;  %vm810_vm1 = vweird.f32 %v1400_v0 }
 0xc1a   :  { %v820_v20 = vmul.f32 %v1402_v7, %v803_v16  ;;  %vm811_vm6 = vmor %vm809_vm5, %vm810_vm1  ;;  %vm825_vm8 = vweird.f32 %v1402_v7 }
 0xc1b   :  { %v806_v18 = vsub.f32 1.0, %v805_v17  ;;  %vm826_vm10 = vmor %vm824_vm9, %vm825_vm8 }
 0xc1c   :  { %v821_v21 = vsub.f32 1.0, %v820_v20 }
 0xc1d   :  { %v807_v19 = vmul.f32 %v1400_v0, %v806_v18 }
 0xc1e   :  { %v822_v3 = vmul.f32 %v1402_v7, %v821_v21 }
 0xc1f   :  { %v808_v14 = vadd.f32 %v1400_v0, %v807_v19 }
 0xc20   :  { %v823_v28 = vadd.f32 %v1402_v7, %v822_v3 }
 0xc21   :  { %v812_v24 = vsel %vm811_vm6, %v1400_v0, %v808_v14 }
 0xc22   :  { %v817_v25 = vsel %vm814_vm7, %v816_v6, %v812_v24  ;;  %v827_v31 = vsel %vm826_vm10, %v1402_v7, %v823_v28 }
 0xc23   :  { %v832_v34 = vsel %vm829_vm3, %v831_v32, %v827_v31  ;;  %v836_v36 = vmul.f32 %v817_v25, %v1698_v50  ;;  %v870_v50 = vld [vmem:[#allocation2 + $0x60] sm:$0xff] }
 0xc24   :  { %v837_v40 = vmul.f32 %v832_v34, %v1702_v54 }
 0xc79   :  { %v841_v26 = vpop.permute.xlu0 %840 }
 0xc7a   :  { %v846_v27 = vmul.f32 %v841_v26, %v817_v25 }
 0xc7c   :  { %850 = vrot.lane.b32.xlu2 %v846_v27, %s1475_s2 }
 0xc81   :  { %v843_v33 = vpop.permute.xlu1 %842 }
 0xc82   :  { %v847_v35 = vmul.f32 %v843_v33, %v832_v34 }
 0xc84   :  { %852 = vrot.lane.b32.xlu0 %v847_v35, %s1475_s2 }
 0xcd6   :  { %v851_v37 = vpop.permute.xlu2 %850 }
 0xcd7   :  { %v1716_v38 = vadd.f32 %v851_v37, %v836_v36 }
 0xcd9   :  { %1403 = vtanh.f32 %v1716_v38 }
 0xcdf   :  { %v1404_v39 = vpop.eup %1403 }
 0xce0   :  { %862 = vrot.lane.b32.xlu1 %v1404_v39, %s1475_s2 }
 0xcf6   :  { %v853_v41 = vpop.permute.xlu0 %852 }
 0xcf7   :  { %v1721_v42 = vadd.f32 %v853_v41, %v837_v40 }
 0xcf9   :  { %1405 = vtanh.f32 %v1721_v42 }
 0xcff   :  { %v1406_v43 = vpop.eup %1405 }
 0xd00   :  { %864 = vrot.lane.b32.xlu2 %v1406_v43, %s1475_s2 }
 0xd52   :  { %v863_v44 = vpop.permute.xlu1 %862 }
 0xd53   :  { %v868_v45 = vmul.f32 %v863_v44, %v817_v25 }
 0xd55   :  { %874 = vrot.lane.b32.xlu0 %v868_v45, %s1477_s14 }
 0xd5a   :  { %v865_v46 = vpop.permute.xlu2 %864 }
 0xd5b   :  { %v869_v47 = vmul.f32 %v865_v46, %v832_v34 }
 0xd5d   :  { %876 = vrot.lane.b32.xlu1 %v869_v47, %s1477_s14 }
 0xdc7   :  { %v875_v48 = vpop.permute.xlu0 %874 }
 0xdc8   :  { %1276 = vmatmul.msk.f32.vlgmr.msrb.gmra.mxu1 %vm29_vm2, %v875_v48 }
 0xdcf   :  { %v877_v49 = vpop.permute.xlu1 %876 }
 0xdd0   :  { %1277 = vmatmul.msk.f32.gmra.mxu1 %vm29_vm2, %v877_v49 }
 0xe45   :  { %v899_v51 = vpop.f32.mrf.mxu1 }
 0xe46   :  { %v905_v52 = vadd.f32 %v899_v51, %v870_v50 }
 0xe48   :  { %1407 = vtanh.f32 %v905_v52  ;;  %v1278_v58 = vmul.f32 -1.442695, %v905_v52 }
 0xe4d   :  { %v902_v54 = vpop.f32.mrf.mxu1 }
 0xe4e   :  { %v1408_v55 = vpop.eup %1407  ;;  %v906_v56 = vadd.f32 %v902_v54, %v871_v53 }
 0xe4f   :  { %951 = vrot.lane.b32.xlu2 %v1408_v55, %s1476_s3 }
 0xe50   :  { %1409 = vtanh.f32 %v906_v56  ;;  %v1279_v1 = vmul.f32 -1.442695, %v906_v56 }
 0xe51   :  { %1411 = vpow2.f32 %v1278_v58 }
 0xe56   :  { %v1410_v57 = vpop.eup %1409 }
 0xe57   :  { %953 = vrot.lane.b32.xlu0 %v1410_v57, %s1476_s3  ;;  %v1412_v59 = vpop.eup %1411 }
 0xe58   :  { %v913_v60 = vadd.f32 1.0, %v1412_v59 }
 0xe5a   :  { %1413 = vrcp.f32 %v913_v60  ;;  %v926_v5 = vand.u32 2147483648, %v913_v60  ;;  %vm920_vm11 = vweird.f32 %v913_v60  ;;  %v924_v8 = vand.u32 2147483647, %v913_v60 }
 0xe5b   :  { %1415 = vpow2.f32 %v1279_v1 }
 0xe5c   :  { %v927_v12 = vor.u32 1.1754944e-38, %v926_v5  ;;  %vm925_vm13 = vcmp.eq.f32.partialorder %v924_v8, 8.507059e+37 }
 0xe60   :  { %v1414_v61 = vpop.eup %1413 }
 0xe61   :  { %v916_v62 = vmul.f32 %v1414_v61, %v913_v60  ;;  %vm921_vm4 = vweird.f32 %v1414_v61  ;;  %v1416_v10 = vpop.eup %1415 }
 0xe62   :  { %vm922_vm12 = vmor %vm920_vm11, %vm921_vm4  ;;  %v914_v13 = vadd.f32 1.0, %v1416_v10 }
 0xe63   :  { %v917_v63 = vsub.f32 1.0, %v916_v62 }
 0xe64   :  { %1417 = vrcp.f32 %v914_v13  ;;  %v941_v20 = vand.u32 2147483648, %v914_v13  ;;  %vm935_vm15 = vweird.f32 %v914_v13  ;;  %v939_v14 = vand.u32 2147483647, %v914_v13 }
 0xe65   :  { %v918_v2 = vmul.f32 %v1414_v61, %v917_v63 }
 0xe66   :  { %v942_v22 = vor.u32 1.1754944e-38, %v941_v20  ;;  %vm940_vm1 = vcmp.eq.f32.partialorder %v939_v14, 8.507059e+37 }
 0xe67   :  { %v919_v4 = vadd.f32 %v1414_v61, %v918_v2 }
 0xe69   :  { %v923_v11 = vsel %vm922_vm12, %v1414_v61, %v919_v4 }
 0xe6a   :  { %v928_v15 = vsel %vm925_vm13, %v927_v12, %v923_v11  ;;  %v1418_v0 = vpop.eup %1417 }
 0xe6b   :  { %v931_v17 = vmul.f32 %v1418_v0, %v914_v13  ;;  %vm936_vm14 = vweird.f32 %v1418_v0  ;;  %v947_v6 = vmul.f32 %v928_v15, %v1716_v38  ;;  %v981_v38 = vld [vmem:[#allocation2 + $0x70] sm:$0xff] }
 0xe6c   :  { %vm937_vm0 = vmor %vm935_vm15, %vm936_vm14 }
 0xe6d   :  { %v932_v18 = vsub.f32 1.0, %v931_v17 }
 0xe6f   :  { %v933_v7 = vmul.f32 %v1418_v0, %v932_v18 }
 0xe71   :  { %v934_v19 = vadd.f32 %v1418_v0, %v933_v7 }
 0xe73   :  { %v938_v21 = vsel %vm937_vm0, %v1418_v0, %v934_v19 }
 0xe74   :  { %v943_v24 = vsel %vm940_vm1, %v942_v22, %v938_v21  ;;  %v1297_v22 = vld [vmem:[%s1776_s4] sm:$0xff]  ;;  %s1478_s4 = smov 112  }
 0xe75   :  { %v948_v27 = vmul.f32 %v943_v24, %v1721_v42  ;;  %v982_v42 = vld [vmem:[#allocation2 + $0x78] sm:$0xff]  ;;  %1141 = vmatpush.bf16.msra.mxu3 %v1297_v22 }
 0xea9   :  { %v952_v9 = vpop.permute.xlu2 %951 }
 0xeaa   :  { %v957_v16 = vmul.f32 %v952_v9, %v928_v15 }
 0xeac   :  { %961 = vrot.lane.b32.xlu1 %v957_v16, %s1475_s2 }
 0xec9   :  { %v954_v23 = vpop.permute.xlu0 %953 }
 0xeca   :  { %v958_v3 = vmul.f32 %v954_v23, %v943_v24 }
 0xecc   :  { %963 = vrot.lane.b32.xlu2 %v958_v3, %s1475_s2 }
 0xf1e   :  { %v962_v25 = vpop.permute.xlu1 %961 }
 0xf1f   :  { %v1734_v26 = vadd.f32 %v962_v25, %v947_v6 }
 0xf21   :  { %1419 = vtanh.f32 %v1734_v26 }
 0xf26   :  { %v964_v28 = vpop.permute.xlu2 %963 }
 0xf27   :  { %v1420_v29 = vpop.eup %1419  ;;  %v1738_v30 = vadd.f32 %v964_v28, %v948_v27  ;;  %v1310_v27 = vld [vmem:[%s1777_s5] ss:$0 sm:$0xff]  ;;  %s1479_s5 = smov [#allocation5]  }
 0xf28   :  { %973 = vrot.lane.b32.xlu0 %v1420_v29, %s1475_s2  ;;  %s1198_s24 = sshll.u32 %s1479_s5, 4  ;;  %s1199_s24 = int_to_ptr.vmem [resolvable:$true] %s1198_s24 }
 0xf29   :  { %1421 = vtanh.f32 %v1738_v30 }
 0xf2f   :  { %v1422_v31 = vpop.eup %1421 }
 0xf30   :  { %975 = vrot.lane.b32.xlu1 %v1422_v31, %s1475_s2 }
 0xf9a   :  { %v974_v32 = vpop.permute.xlu0 %973 }
 0xf9b   :  { %v979_v33 = vmul.f32 %v974_v32, %v928_v15 }
 0xf9d   :  { %985 = vrot.lane.b32.xlu2 %v979_v33, %s1477_s14 }
 0xfa2   :  { %v976_v34 = vpop.permute.xlu1 %975 }
 0xfa3   :  { %v980_v35 = vmul.f32 %v976_v34, %v943_v24 }
 0xfa5   :  { %987 = vrot.lane.b32.xlu0 %v980_v35, %s1477_s14 }
 0xff7   :  { %v986_v36 = vpop.permute.xlu2 %985 }
 0xff8   :  { %1280 = vmatmul.msk.f32.vlgmr.msrb.gmra.mxu2 %vm29_vm2, %v986_v36 }
0x1017   :  { %v988_v37 = vpop.permute.xlu0 %987 }
0x1018   :  { %1281 = vmatmul.msk.f32.gmra.mxu2 %vm29_vm2, %v988_v37 }
0x107b   :  { %v1010_v39 = vpop.f32.mrf.mxu2 }
0x107c   :  { %v1016_v40 = vadd.f32 %v1010_v39, %v981_v38 }
0x107e   :  { %1423 = vtanh.f32 %v1016_v40  ;;  %v1282_v46 = vmul.f32 -1.442695, %v1016_v40 }
0x1084   :  { %v1424_v41 = vpop.eup %1423 }
0x1085   :  { %1062 = vrot.lane.b32.xlu1 %v1424_v41, %s1476_s3 }
0x109b   :  { %v1013_v43 = vpop.f32.mrf.mxu2 }
0x109c   :  { %v1017_v44 = vadd.f32 %v1013_v43, %v982_v42 }
0x109e   :  { %1425 = vtanh.f32 %v1017_v44  ;;  %v1283_v47 = vmul.f32 -1.442695, %v1017_v44 }
0x109f   :  { %1427 = vpow2.f32 %v1282_v46 }
0x10a0   :  { %1429 = vpow2.f32 %v1283_v47 }
0x10a4   :  { %v1426_v45 = vpop.eup %1425 }
0x10a5   :  { %1064 = vrot.lane.b32.xlu2 %v1426_v45, %s1476_s3  ;;  %v1428_v48 = vpop.eup %1427 }
0x10a6   :  { %v1024_v49 = vadd.f32 1.0, %v1428_v48  ;;  %v1430_v50 = vpop.eup %1429 }
0x10a7   :  { %v1025_v51 = vadd.f32 1.0, %v1430_v50 }
0x10a8   :  { %1431 = vrcp.f32 %v1024_v49  ;;  %v1037_v60 = vand.u32 2147483648, %v1024_v49  ;;  %vm1031_vm6 = vweird.f32 %v1024_v49  ;;  %v1035_v61 = vand.u32 2147483647, %v1024_v49 }
0x10a9   :  { %1433 = vrcp.f32 %v1025_v51  ;;  %v1052_v10 = vand.u32 2147483648, %v1025_v51  ;;  %vm1046_vm10 = vweird.f32 %v1025_v51  ;;  %v1050_v11 = vand.u32 2147483647, %v1025_v51 }
0x10aa   :  { %v1038_v1 = vor.u32 1.1754944e-38, %v1037_v60  ;;  %vm1036_vm8 = vcmp.eq.f32.partialorder %v1035_v61, 8.507059e+37 }
0x10ab   :  { %v1053_v13 = vor.u32 1.1754944e-38, %v1052_v10  ;;  %vm1051_vm4 = vcmp.eq.f32.partialorder %v1050_v11, 8.507059e+37 }
0x10ae   :  { %v1432_v52 = vpop.eup %1431 }
0x10af   :  { %v1027_v53 = vmul.f32 %v1432_v52, %v1024_v49  ;;  %v1434_v55 = vpop.eup %1433  ;;  %vm1032_vm5 = vweird.f32 %v1432_v52 }
0x10b0   :  { %v1042_v57 = vmul.f32 %v1434_v55, %v1025_v51  ;;  %vm1033_vm7 = vmor %vm1031_vm6, %vm1032_vm5  ;;  %vm1047_vm9 = vweird.f32 %v1434_v55 }
0x10b1   :  { %v1028_v54 = vsub.f32 1.0, %v1027_v53  ;;  %vm1048_vm3 = vmor %vm1046_vm10, %vm1047_vm9 }
0x10b2   :  { %v1043_v59 = vsub.f32 1.0, %v1042_v57 }
0x10b3   :  { %v1029_v56 = vmul.f32 %v1432_v52, %v1028_v54 }
0x10b4   :  { %v1044_v63 = vmul.f32 %v1434_v55, %v1043_v59 }
0x10b5   :  { %v1030_v58 = vadd.f32 %v1432_v52, %v1029_v56 }
0x10b6   :  { %v1045_v8 = vadd.f32 %v1434_v55, %v1044_v63 }
0x10b7   :  { %v1034_v62 = vsel %vm1033_vm7, %v1432_v52, %v1030_v58 }
0x10b8   :  { %v1039_v2 = vsel %vm1036_vm8, %v1038_v1, %v1034_v62  ;;  %v1049_v12 = vsel %vm1048_vm3, %v1434_v55, %v1045_v8 }
0x10b9   :  { %v1054_v15 = vsel %vm1051_vm4, %v1053_v13, %v1049_v12  ;;  %v1058_v0 = vmul.f32 %v1039_v2, %v1734_v26 }
0x10ba   :  { %v1059_v7 = vmul.f32 %v1054_v15, %v1738_v30 }
0x10f7   :  { %v1063_v4 = vpop.permute.xlu1 %1062 }
0x10f8   :  { %v1068_v5 = vmul.f32 %v1063_v4, %v1039_v2 }
0x10fa   :  { %1072 = vrot.lane.b32.xlu0 %v1068_v5, %s1475_s2 }
0x10ff   :  { %v1065_v9 = vpop.permute.xlu2 %1064 }
0x1100   :  { %v1069_v16 = vmul.f32 %v1065_v9, %v1054_v15 }
0x1102   :  { %1074 = vrot.lane.b32.xlu1 %v1069_v16, %s1475_s2 }
0x116c   :  { %v1073_v17 = vpop.permute.xlu0 %1072 }
0x116d   :  { %v1078_v18 = vadd.f32 %v1073_v17, %v1058_v0 }
0x116f   :  { %1435 = vtanh.f32 %v1078_v18 }
0x1174   :  { %v1075_v19 = vpop.permute.xlu1 %1074 }
0x1175   :  { %v1436_v20 = vpop.eup %1435  ;;  %v1079_v14 = vadd.f32 %v1075_v19, %v1059_v7 }
0x1176   :  { %1084 = vrot.lane.b32.xlu2 %v1436_v20, %s1475_s2 }
0x1177   :  { %1437 = vtanh.f32 %v1079_v14 }
0x117d   :  { %v1438_v21 = vpop.eup %1437 }
0x117e   :  { %1086 = vrot.lane.b32.xlu0 %v1438_v21, %s1475_s2 }
0x11d0   :  { %v1085_v23 = vpop.permute.xlu2 %1084 }
0x11d1   :  { %v1090_v3 = vmul.f32 %v1085_v23, %v1039_v2 }
0x11f0   :  { %v1087_v24 = vpop.permute.xlu0 %1086 }
0x11f1   :  { %v1091_v6 = vmul.f32 %v1087_v24, %v1054_v15 }
0x11f3   :  { %v1115_v25 = vpack.c.bf16 %v1091_v6, %v1090_v3 }
0x11f5   :  { %1123 = vrot.lane.b32.xlu1 %v1115_v25, %s1477_s14 }
0x1267   :  { %v1124_v26 = vpop.permute.xlu1 %1123 }
0x1268   :  { %1288 = vmatmul.msk.bf16.vlgmr.msra.gmra.mxu3 %vm29_vm2, %v1124_v26 }
0x12eb   :  { %v1143_v28 = vpop.f32.mrf.mxu3 }
0x12ec   :  { %v1144_v29 = vadd.f32 %v1310_v27, %v1143_v28 }
0x12ee   :  { %1148 = vmax.xlane.f32.xlu2 %v1144_v29 }
0x12f3   :  { %v1145_v30 = vpop.f32.mrf.mxu3 }
0x12f4   :  { %v1146_v31 = vadd.f32 %v1310_v27, %v1145_v30 }
0x12f6   :  { %1150 = vmax.xlane.f32.xlu0 %v1146_v31 }
0x130a   :  { %1096 = vrot.lane.b32.xlu0 %v1091_v6, %s1477_s14 }
0x1312   :  { %1106 = vrot.lane.b32.xlu0 %v1079_v14, %s1478_s4 }
0x1361   :  { %v1149_v32 = vpop.xlane.xlu2 %1148 }
0x1362   :  { %v1152_v33 = vsub.f32 %v1144_v29, %v1149_v32 }
0x1364   :  { %v1154_v34 = vmul.f32 1.442695, %v1152_v33 }
0x1366   :  { %1439 = vpow2.f32 %v1154_v34 }
0x1369   :  { %v1151_v35 = vpop.xlane.xlu0 %1150 }
0x136a   :  { %v1153_v36 = vsub.f32 %v1146_v31, %v1151_v35 }
0x136c   :  { %v1440_v37 = vpop.eup %1439  ;;  %v1156_v38 = vmul.f32 1.442695, %v1153_v36 }
0x136d   :  { %1158 = vadd.xlane.f32.xlu1 %v1440_v37 }
0x136e   :  { %1441 = vpow2.f32 %v1156_v38 }
0x1374   :  { %v1442_v39 = vpop.eup %1441 }
0x1375   :  { %1160 = vadd.xlane.f32.xlu2 %v1442_v39 }
0x137c   :  { %v1097_v40 = vpop.permute.xlu0 %1096 }
0x137d   :  { %1101 = vst.msk [vmem:[#allocation3 + $0x8] sm:$0xff] %vm29_vm2, %v1097_v40 }
0x1384   :  { %v1107_v41 = vpop.permute.xlu0 %1106 }
0x1385   :  { %1111 = vst.msk [vmem:[#allocation4 + $0x8] sm:$0xff] %vm29_vm2, %v1107_v41 }
0x1386   :  { %1104 = vrot.lane.b32.xlu1 %v1078_v18, %s1478_s4 }
0x138d   :  { %1094 = vrot.lane.b32.xlu2 %v1090_v3, %s1477_s14 }
0x13e0   :  { %v1159_v42 = vpop.xlane.xlu1 %1158 }
0x13e1   :  { %1443 = vrcp.f32 %v1159_v42  ;;  %v1173_v47 = vand.u32 2147483648, %v1159_v42  ;;  %v1171_v49 = vand.u32 2147483647, %v1159_v42  ;;  %vm1167_vm12 = vweird.f32 %v1159_v42 }
0x13e3   :  { %v1174_v52 = vor.u32 1.1754944e-38, %v1173_v47  ;;  %vm1172_vm14 = vcmp.eq.f32.partialorder %v1171_v49, 8.507059e+37 }
0x13e7   :  { %v1444_v43 = vpop.eup %1443 }
0x13e8   :  { %v1163_v44 = vmul.f32 %v1444_v43, %v1159_v42  ;;  %v1161_v45 = vpop.xlane.xlu2 %1160  ;;  %vm1168_vm11 = vweird.f32 %v1444_v43 }
0x13e9   :  { %1445 = vrcp.f32 %v1161_v45  ;;  %vm1169_vm13 = vmor %vm1167_vm12, %vm1168_vm11  ;;  %v1188_v59 = vand.u32 2147483648, %v1161_v45  ;;  %v1186_v61 = vand.u32 2147483647, %v1161_v45  ;;  %vm1182_vm0 = vweird.f32 %v1161_v45 }
0x13ea   :  { %v1164_v46 = vsub.f32 1.0, %v1163_v44 }
0x13eb   :  { %v1189_v63 = vor.u32 1.1754944e-38, %v1188_v59  ;;  %vm1187_vm5 = vcmp.eq.f32.partialorder %v1186_v61, 8.507059e+37 }
0x13ec   :  { %v1165_v48 = vmul.f32 %v1444_v43, %v1164_v46 }
0x13ee   :  { %v1166_v50 = vadd.f32 %v1444_v43, %v1165_v48 }
0x13ef   :  { %v1446_v51 = vpop.eup %1445 }
0x13f0   :  { %v1170_v53 = vsel %vm1169_vm13, %v1444_v43, %v1166_v50  ;;  %v1178_v54 = vmul.f32 %v1446_v51, %v1161_v45  ;;  %v1095_v55 = vpop.permute.xlu2 %1094  ;;  %vm1183_vm15 = vweird.f32 %v1446_v51 }
0x13f1   :  { %v1175_v56 = vsel %vm1172_vm14, %v1174_v52, %v1170_v53  ;;  %1100 = vst.msk [vmem:[#allocation3] sm:$0xff] %vm29_vm2, %v1095_v55  ;;  %vm1184_vm1 = vmor %vm1182_vm0, %vm1183_vm15 }
0x13f2   :  { %v1179_v57 = vsub.f32 1.0, %v1178_v54  ;;  %v1176_v58 = vmul.f32 %v1440_v37, %v1175_v56 }
0x13f4   :  { %v1180_v60 = vmul.f32 %v1446_v51, %v1179_v57  ;;  %1192 = vst [vmem:[#allocation5] sm:$0xff] %v1176_v58 }
0x13f6   :  { %v1181_v62 = vadd.f32 %v1446_v51, %v1180_v60 }
0x13f8   :  { %v1185_v1 = vsel %vm1184_vm1, %v1446_v51, %v1181_v62  ;;  %v1105_v2 = vpop.permute.xlu1 %1104 }
0x13f9   :  { %v1190_v4 = vsel %vm1187_vm5, %v1189_v63, %v1185_v1  ;;  %1110 = vst.msk [vmem:[#allocation4] sm:$0xff] %vm29_vm2, %v1105_v2 }
0x13fa   :  { %v1191_v5 = vmul.f32 %v1442_v39, %v1190_v4 }
0x13fc   :  { %1193 = vst [vmem:[#allocation5 + $0x8] sm:$0xff] %v1191_v5 }
0x13fd   :  { %1206 = dma.vmem_to_hbm [thread:$0]  %s1199_s24, 256, %s1201_s1, [#allocation6], %s1480_s27, %s1480_s27, %s1481_s28  }
0x13fe   :  { %1471 = dma.done.wait [#allocation6], 256  }
0x13ff   :  { %1472 = vsyncadd [#allocation6], 4294967040 }
0x1400   :  { %1211 = vsyncpa [#allocation6], 1 }

</bundles_post_ra>
